<compile_context>
chip_gen: v5e
topology: v5e:2x2
jax: 0.10.0
libtpu: 0.0.40
codegen_flags: <defaults>
</compile_context>

<pallas_src>
import jax
import jax.numpy as jnp
from jax.experimental import pallas as pl
from jax.experimental.pallas import tpu as pltpu


def _round_up(a, m):
    return (a + m - 1) // m * m


def mlp_agg_kernel(x_ref, w1_ref, b1_ref, w2_ref, b2_ref, out_ref):
    tb, nc, f = x_ref.shape          # (TB, NC, F_pad), static
    cdt = w1_ref.dtype               # matmul compute dtype (bf16 or f32)

    # ---- Layer 1: h = ReLU(x_flat @ W1 + b1), as a sum of per-clip matmuls ----
    h = jnp.zeros((tb, f), jnp.float32)
    for c in range(nc):              # NC is small & static -> unrolled
        h = h + jnp.dot(x_ref[:, c, :].astype(cdt), w1_ref[c],
                        preferred_element_type=jnp.float32)
    h = jnp.maximum(h + b1_ref[...], 0.0)

    # ---- Layer 2 + Sigmoid: per-clip gating weights (f32 elementwise) ----
    logits = jnp.dot(h.astype(w2_ref.dtype), w2_ref[...],
                     preferred_element_type=jnp.float32) + b2_ref[...]
    gates = jax.nn.sigmoid(logits) * (1.0 / nc)       # fold the 1/NC of the mean

    # ---- Weighted mean over clips, accumulated per clip (no (TB,NC,F) temp) ----
    acc = jnp.zeros((tb, f), jnp.float32)
    for c in range(nc):
        acc = acc + x_ref[:, c, :].astype(jnp.float32) * gates[:, c:c + 1]
    out_ref[...] = acc.astype(out_ref.dtype)


def mlp_aggregation_weights(x, w1, b1, w2, b2, *, block_b=None,
                            compute_dtype=jnp.bfloat16):
    """x: (B, NC, F); w1: (NC*F, F); b1: (F,); w2: (F, NC); b2: (NC,)."""
    B, NC, F = x.shape
    assert w1.shape == (NC * F, F) and w2.shape == (F, NC)
    out_dtype = x.dtype

    # Lane-dense feature dim: pad F to a multiple of 128 (zero padding is exact).
    F_pad = _round_up(F, 128)
    pf = F_pad - F

    # Torch's row-major x.view(b, -1) @ w1 == sum_c x[:,c,:] @ w1.reshape(NC,F,F)[c].
    w1_3d = w1.reshape(NC, F, F)
    if pf:
        x = jnp.pad(x, ((0, 0), (0, 0), (0, pf)))
        w1_3d = jnp.pad(w1_3d, ((0, 0), (0, pf), (0, pf)))
        w2 = jnp.pad(w2, ((0, pf), (0, 0)))
        b1 = jnp.pad(b1, ((0, pf),))
    w1_c = w1_3d.astype(compute_dtype)           # halves weight DMA + bf16 MXU
    w2_c = w2.astype(compute_dtype)
    b1r = b1.reshape(1, F_pad).astype(jnp.float32)
    b2r = b2.reshape(1, NC).astype(jnp.float32)

    # Batch tile: multiple of 8 sublanes, sized against a conservative VMEM
    # budget (double-buffered x + out) so it also fits v7x's smaller VMEM.
    if block_b is None:
        budget = 24 * 1024 * 1024
        per_row = 2 * 4 * (NC * F_pad + F_pad)    # x-in + out, double-buffered f32
        block_b = max(8, min(256, (budget // per_row) // 8 * 8))
    TB = min(block_b, _round_up(B, 8))
    B_pad = _round_up(B, TB)
    if B_pad != B:
        x = jnp.pad(x, ((0, B_pad - B), (0, 0), (0, 0)))

    out = pl.pallas_call(
        mlp_agg_kernel,
        out_shape=jax.ShapeDtypeStruct((B_pad, F_pad), out_dtype),
        grid=(B_pad // TB,),
        in_specs=[
            pl.BlockSpec((TB, NC, F_pad), lambda i: (i, 0, 0)),   # x tile (pipelined)
            pl.BlockSpec((NC, F_pad, F_pad), lambda i: (0, 0, 0)),  # W1 resident
            pl.BlockSpec((1, F_pad), lambda i: (0, 0)),             # b1 resident
            pl.BlockSpec((F_pad, NC), lambda i: (0, 0)),            # W2 resident
            pl.BlockSpec((1, NC), lambda i: (0, 0)),                # b2 resident
        ],
        out_specs=pl.BlockSpec((TB, F_pad), lambda i: (i, 0)),
        compiler_params=pltpu.CompilerParams(
            dimension_semantics=("parallel",)),
    )(x, w1_c, b1r, w2_c, b2r)

    return out[:B, :F]


def _torch_linear_init(key, fan_in, fan_out):
    """Deterministic init mimicking nn.Linear default: U(-1/sqrt(fan_in), +1/sqrt(fan_in))."""
    kw, kb = jax.random.split(key)
    bound = 1.0 / jnp.sqrt(fan_in)
    w = jax.random.uniform(kw, (fan_in, fan_out), jnp.float32, -bound, bound)
    b = jax.random.uniform(kb, (fan_out,), jnp.float32, -bound, bound)
    return w, b


def reference(x, w1, b1, w2, b2):
    B, NC, F = x.shape
    h = jnp.maximum(x.reshape(B, NC * F) @ w1 + b1, 0.0)
    gates = jax.nn.sigmoid(h @ w2 + b2)
    return jnp.mean(x * gates[:, :, None], axis=1)


if __name__ == "__main__":
    B, n_clips, feature_size = 2, 8, 32

    key = jax.random.PRNGKey(0)
    kx, k1, k2 = jax.random.split(key, 3)

    x = jax.random.normal(kx, (B, n_clips, feature_size), jnp.float32)
    # Linear(n_clips*feature_size -> feature_size)
    w1, b1 = _torch_linear_init(k1, n_clips * feature_size, feature_size)
    # Linear(feature_size -> n_clips)
    w2, b2 = _torch_linear_init(k2, feature_size, n_clips)
    # NOTE: defaults (layers=1, add_bn=False, dropout=0.0) -> Dropout is identity,
    # no BatchNorm, no intermediate layers.

    ref = reference(x, w1, b1, w2, b2)

    # Exact-math path (f32 matmuls) -> tight tolerance.
    out_f32 = jax.block_until_ready(
        mlp_aggregation_weights(x, w1, b1, w2, b2, compute_dtype=jnp.float32))
    assert out_f32.shape == (B, feature_size)
    assert jnp.allclose(out_f32, ref, atol=1e-5, rtol=1e-5), "f32 kernel mismatch"

    # Default fast path (bf16 matmul operands, f32 accumulation/elementwise).
    out = jax.block_until_ready(mlp_aggregation_weights(x, w1, b1, w2, b2))
    assert out.shape == (B, feature_size)
    assert jnp.allclose(out, ref, atol=3e-2, rtol=3e-2), "bf16 kernel mismatch"

    print("KERNEL_OK")
</pallas_src>

<mosaic_0001>
module attributes {stable_mosaic.version = 11 : i64} {
  func.func @mlp_agg_kernel(%arg0: i32, %arg1: memref<8x8x128xf32, #tpu.memory_space<vmem>>, %arg2: memref<8x128x128xf32, #tpu.memory_space<vmem>>, %arg3: memref<1x128xf32, #tpu.memory_space<vmem>>, %arg4: memref<128x8xf32, #tpu.memory_space<vmem>>, %arg5: memref<1x8xf32, #tpu.memory_space<vmem>>, %arg6: memref<8x128xf32, #tpu.memory_space<vmem>>) attributes {dimension_semantics = [#tpu.dimension_semantics<parallel>], iteration_bounds = array<i64: 1>, scalar_prefetch = 0 : i64, scratch_operands = 0 : i64, tpu.core_type = #tpu.core_type<tc>, window_params = [{transform_indices = @transform_0, window_bounds = array<i64: 8, 8, 128>}, {pipeline_mode = #tpu.pipeline_mode<synchronous>, transform_indices = @transform_1, window_bounds = array<i64: 8, 128, 128>}, {pipeline_mode = #tpu.pipeline_mode<synchronous>, transform_indices = @transform_2, window_bounds = array<i64: 1, 128>}, {pipeline_mode = #tpu.pipeline_mode<synchronous>, transform_indices = @transform_3, window_bounds = array<i64: 128, 8>}, {pipeline_mode = #tpu.pipeline_mode<synchronous>, transform_indices = @transform_4, window_bounds = array<i64: 1, 8>}, {transform_indices = @transform_5, window_bounds = array<i64: 8, 128>}]} {
    %cst = arith.constant 0.000000e+00 : f32
    %0 = vector.broadcast %cst : f32 to vector<8x128xf32>
    %c0 = arith.constant 0 : index
    %c0_0 = arith.constant 0 : index
    %c0_1 = arith.constant 0 : index
    %1 = vector.load %arg1[%c0, %c0_0, %c0_1] : memref<8x8x128xf32, #tpu.memory_space<vmem>>, vector<8x1x128xf32>
    %2 = vector.shape_cast %1 : vector<8x1x128xf32> to vector<8x128xf32>
    %c0_2 = arith.constant 0 : index
    %c0_3 = arith.constant 0 : index
    %c0_4 = arith.constant 0 : index
    %3 = vector.load %arg2[%c0_2, %c0_3, %c0_4] : memref<8x128x128xf32, #tpu.memory_space<vmem>>, vector<1x128x128xf32>
    %4 = vector.shape_cast %3 : vector<1x128x128xf32> to vector<128x128xf32>
    %cst_5 = arith.constant dense<0.000000e+00> : vector<8x128xf32>
    %5 = tpu.matmul %2, %4, %cst_5 {dimension_numbers = #tpu.dot_dimension_numbers<[1], [0], [0], [1], [0, 0, 1, 1], [], []>} : vector<8x128xf32>, vector<128x128xf32>, vector<8x128xf32> -> vector<8x128xf32>
    %6 = arith.addf %0, %5 : vector<8x128xf32>
    %c0_6 = arith.constant 0 : index
    %c1 = arith.constant 1 : index
    %c0_7 = arith.constant 0 : index
    %7 = vector.load %arg1[%c0_6, %c1, %c0_7] : memref<8x8x128xf32, #tpu.memory_space<vmem>>, vector<8x1x128xf32>
    %8 = vector.shape_cast %7 : vector<8x1x128xf32> to vector<8x128xf32>
    %c1_8 = arith.constant 1 : index
    %c0_9 = arith.constant 0 : index
    %c0_10 = arith.constant 0 : index
    %9 = vector.load %arg2[%c1_8, %c0_9, %c0_10] : memref<8x128x128xf32, #tpu.memory_space<vmem>>, vector<1x128x128xf32>
    %10 = vector.shape_cast %9 : vector<1x128x128xf32> to vector<128x128xf32>
    %cst_11 = arith.constant dense<0.000000e+00> : vector<8x128xf32>
    %11 = tpu.matmul %8, %10, %cst_11 {dimension_numbers = #tpu.dot_dimension_numbers<[1], [0], [0], [1], [0, 0, 1, 1], [], []>} : vector<8x128xf32>, vector<128x128xf32>, vector<8x128xf32> -> vector<8x128xf32>
    %12 = arith.addf %6, %11 : vector<8x128xf32>
    %c0_12 = arith.constant 0 : index
    %c2 = arith.constant 2 : index
    %c0_13 = arith.constant 0 : index
    %13 = vector.load %arg1[%c0_12, %c2, %c0_13] : memref<8x8x128xf32, #tpu.memory_space<vmem>>, vector<8x1x128xf32>
    %14 = vector.shape_cast %13 : vector<8x1x128xf32> to vector<8x128xf32>
    %c2_14 = arith.constant 2 : index
    %c0_15 = arith.constant 0 : index
    %c0_16 = arith.constant 0 : index
    %15 = vector.load %arg2[%c2_14, %c0_15, %c0_16] : memref<8x128x128xf32, #tpu.memory_space<vmem>>, vector<1x128x128xf32>
    %16 = vector.shape_cast %15 : vector<1x128x128xf32> to vector<128x128xf32>
    %cst_17 = arith.constant dense<0.000000e+00> : vector<8x128xf32>
    %17 = tpu.matmul %14, %16, %cst_17 {dimension_numbers = #tpu.dot_dimension_numbers<[1], [0], [0], [1], [0, 0, 1, 1], [], []>} : vector<8x128xf32>, vector<128x128xf32>, vector<8x128xf32> -> vector<8x128xf32>
    %18 = arith.addf %12, %17 : vector<8x128xf32>
    %c0_18 = arith.constant 0 : index
    %c3 = arith.constant 3 : index
    %c0_19 = arith.constant 0 : index
    %19 = vector.load %arg1[%c0_18, %c3, %c0_19] : memref<8x8x128xf32, #tpu.memory_space<vmem>>, vector<8x1x128xf32>
    %20 = vector.shape_cast %19 : vector<8x1x128xf32> to vector<8x128xf32>
    %c3_20 = arith.constant 3 : index
    %c0_21 = arith.constant 0 : index
    %c0_22 = arith.constant 0 : index
    %21 = vector.load %arg2[%c3_20, %c0_21, %c0_22] : memref<8x128x128xf32, #tpu.memory_space<vmem>>, vector<1x128x128xf32>
    %22 = vector.shape_cast %21 : vector<1x128x128xf32> to vector<128x128xf32>
    %cst_23 = arith.constant dense<0.000000e+00> : vector<8x128xf32>
    %23 = tpu.matmul %20, %22, %cst_23 {dimension_numbers = #tpu.dot_dimension_numbers<[1], [0], [0], [1], [0, 0, 1, 1], [], []>} : vector<8x128xf32>, vector<128x128xf32>, vector<8x128xf32> -> vector<8x128xf32>
    %24 = arith.addf %18, %23 : vector<8x128xf32>
    %c0_24 = arith.constant 0 : index
    %c4 = arith.constant 4 : index
    %c0_25 = arith.constant 0 : index
    %25 = vector.load %arg1[%c0_24, %c4, %c0_25] : memref<8x8x128xf32, #tpu.memory_space<vmem>>, vector<8x1x128xf32>
    %26 = vector.shape_cast %25 : vector<8x1x128xf32> to vector<8x128xf32>
    %c4_26 = arith.constant 4 : index
    %c0_27 = arith.constant 0 : index
    %c0_28 = arith.constant 0 : index
    %27 = vector.load %arg2[%c4_26, %c0_27, %c0_28] : memref<8x128x128xf32, #tpu.memory_space<vmem>>, vector<1x128x128xf32>
    %28 = vector.shape_cast %27 : vector<1x128x128xf32> to vector<128x128xf32>
    %cst_29 = arith.constant dense<0.000000e+00> : vector<8x128xf32>
    %29 = tpu.matmul %26, %28, %cst_29 {dimension_numbers = #tpu.dot_dimension_numbers<[1], [0], [0], [1], [0, 0, 1, 1], [], []>} : vector<8x128xf32>, vector<128x128xf32>, vector<8x128xf32> -> vector<8x128xf32>
    %30 = arith.addf %24, %29 : vector<8x128xf32>
    %c0_30 = arith.constant 0 : index
    %c5 = arith.constant 5 : index
    %c0_31 = arith.constant 0 : index
    %31 = vector.load %arg1[%c0_30, %c5, %c0_31] : memref<8x8x128xf32, #tpu.memory_space<vmem>>, vector<8x1x128xf32>
    %32 = vector.shape_cast %31 : vector<8x1x128xf32> to vector<8x128xf32>
    %c5_32 = arith.constant 5 : index
    %c0_33 = arith.constant 0 : index
    %c0_34 = arith.constant 0 : index
    %33 = vector.load %arg2[%c5_32, %c0_33, %c0_34] : memref<8x128x128xf32, #tpu.memory_space<vmem>>, vector<1x128x128xf32>
    %34 = vector.shape_cast %33 : vector<1x128x128xf32> to vector<128x128xf32>
    %cst_35 = arith.constant dense<0.000000e+00> : vector<8x128xf32>
    %35 = tpu.matmul %32, %34, %cst_35 {dimension_numbers = #tpu.dot_dimension_numbers<[1], [0], [0], [1], [0, 0, 1, 1], [], []>} : vector<8x128xf32>, vector<128x128xf32>, vector<8x128xf32> -> vector<8x128xf32>
    %36 = arith.addf %30, %35 : vector<8x128xf32>
    %c0_36 = arith.constant 0 : index
    %c6 = arith.constant 6 : index
    %c0_37 = arith.constant 0 : index
    %37 = vector.load %arg1[%c0_36, %c6, %c0_37] : memref<8x8x128xf32, #tpu.memory_space<vmem>>, vector<8x1x128xf32>
    %38 = vector.shape_cast %37 : vector<8x1x128xf32> to vector<8x128xf32>
    %c6_38 = arith.constant 6 : index
    %c0_39 = arith.constant 0 : index
    %c0_40 = arith.constant 0 : index
    %39 = vector.load %arg2[%c6_38, %c0_39, %c0_40] : memref<8x128x128xf32, #tpu.memory_space<vmem>>, vector<1x128x128xf32>
    %40 = vector.shape_cast %39 : vector<1x128x128xf32> to vector<128x128xf32>
    %cst_41 = arith.constant dense<0.000000e+00> : vector<8x128xf32>
    %41 = tpu.matmul %38, %40, %cst_41 {dimension_numbers = #tpu.dot_dimension_numbers<[1], [0], [0], [1], [0, 0, 1, 1], [], []>} : vector<8x128xf32>, vector<128x128xf32>, vector<8x128xf32> -> vector<8x128xf32>
    %42 = arith.addf %36, %41 : vector<8x128xf32>
    %c0_42 = arith.constant 0 : index
    %c7 = arith.constant 7 : index
    %c0_43 = arith.constant 0 : index
    %43 = vector.load %arg1[%c0_42, %c7, %c0_43] : memref<8x8x128xf32, #tpu.memory_space<vmem>>, vector<8x1x128xf32>
    %44 = vector.shape_cast %43 : vector<8x1x128xf32> to vector<8x128xf32>
    %c7_44 = arith.constant 7 : index
    %c0_45 = arith.constant 0 : index
    %c0_46 = arith.constant 0 : index
    %45 = vector.load %arg2[%c7_44, %c0_45, %c0_46] : memref<8x128x128xf32, #tpu.memory_space<vmem>>, vector<1x128x128xf32>
    %46 = vector.shape_cast %45 : vector<1x128x128xf32> to vector<128x128xf32>
    %cst_47 = arith.constant dense<0.000000e+00> : vector<8x128xf32>
    %47 = tpu.matmul %44, %46, %cst_47 {dimension_numbers = #tpu.dot_dimension_numbers<[1], [0], [0], [1], [0, 0, 1, 1], [], []>} : vector<8x128xf32>, vector<128x128xf32>, vector<8x128xf32> -> vector<8x128xf32>
    %48 = arith.addf %42, %47 : vector<8x128xf32>
    %c0_48 = arith.constant 0 : index
    %c0_49 = arith.constant 0 : index
    %49 = vector.load %arg3[%c0_48, %c0_49] : memref<1x128xf32, #tpu.memory_space<vmem>>, vector<1x128xf32>
    %50 = vector.broadcast %49 : vector<1x128xf32> to vector<8x128xf32>
    %51 = arith.addf %48, %50 : vector<8x128xf32>
    %cst_50 = arith.constant 0.000000e+00 : f32
    %52 = vector.broadcast %cst_50 : f32 to vector<8x128xf32>
    %53 = arith.maximumf %51, %52 : vector<8x128xf32>
    %c0_51 = arith.constant 0 : index
    %c0_52 = arith.constant 0 : index
    %54 = vector.load %arg4[%c0_51, %c0_52] : memref<128x8xf32, #tpu.memory_space<vmem>>, vector<128x8xf32>
    %cst_53 = arith.constant dense<0.000000e+00> : vector<8x8xf32>
    %55 = tpu.matmul %53, %54, %cst_53 {dimension_numbers = #tpu.dot_dimension_numbers<[1], [0], [0], [1], [0, 0, 1, 1], [], []>} : vector<8x128xf32>, vector<128x8xf32>, vector<8x8xf32> -> vector<8x8xf32>
    %c0_54 = arith.constant 0 : index
    %c0_55 = arith.constant 0 : index
    %56 = vector.load %arg5[%c0_54, %c0_55] : memref<1x8xf32, #tpu.memory_space<vmem>>, vector<1x8xf32>
    %57 = vector.broadcast %56 : vector<1x8xf32> to vector<8x8xf32>
    %58 = arith.addf %55, %57 : vector<8x8xf32>
    %59 = arith.negf %58 : vector<8x8xf32>
    %60 = math.exp %59 : vector<8x8xf32>
    %cst_56 = arith.constant 1.000000e+00 : f32
    %61 = vector.broadcast %cst_56 : f32 to vector<8x8xf32>
    %62 = arith.addf %61, %60 : vector<8x8xf32>
    %63 = arith.divf %61, %62 : vector<8x8xf32>
    %cst_57 = arith.constant 1.250000e-01 : f32
    %64 = vector.broadcast %cst_57 : f32 to vector<8x8xf32>
    %65 = arith.mulf %63, %64 : vector<8x8xf32>
    %cst_58 = arith.constant 0.000000e+00 : f32
    %66 = vector.broadcast %cst_58 : f32 to vector<8x128xf32>
    %c0_59 = arith.constant 0 : index
    %c0_60 = arith.constant 0 : index
    %c0_61 = arith.constant 0 : index
    %67 = vector.load %arg1[%c0_59, %c0_60, %c0_61] : memref<8x8x128xf32, #tpu.memory_space<vmem>>, vector<8x1x128xf32>
    %68 = vector.shape_cast %67 : vector<8x1x128xf32> to vector<8x128xf32>
    %69 = vector.extract_strided_slice %65 {offsets = [0, 0], sizes = [8, 1], strides = [1, 1]} : vector<8x8xf32> to vector<8x1xf32>
    %70 = vector.broadcast %69 : vector<8x1xf32> to vector<8x128xf32>
    %71 = arith.mulf %68, %70 : vector<8x128xf32>
    %72 = arith.addf %66, %71 : vector<8x128xf32>
    %c0_62 = arith.constant 0 : index
    %c1_63 = arith.constant 1 : index
    %c0_64 = arith.constant 0 : index
    %73 = vector.load %arg1[%c0_62, %c1_63, %c0_64] : memref<8x8x128xf32, #tpu.memory_space<vmem>>, vector<8x1x128xf32>
    %74 = vector.shape_cast %73 : vector<8x1x128xf32> to vector<8x128xf32>
    %75 = vector.extract_strided_slice %65 {offsets = [0, 1], sizes = [8, 1], strides = [1, 1]} : vector<8x8xf32> to vector<8x1xf32>
    %76 = vector.broadcast %75 : vector<8x1xf32> to vector<8x128xf32>
    %77 = arith.mulf %74, %76 : vector<8x128xf32>
    %78 = arith.addf %72, %77 : vector<8x128xf32>
    %c0_65 = arith.constant 0 : index
    %c2_66 = arith.constant 2 : index
    %c0_67 = arith.constant 0 : index
    %79 = vector.load %arg1[%c0_65, %c2_66, %c0_67] : memref<8x8x128xf32, #tpu.memory_space<vmem>>, vector<8x1x128xf32>
    %80 = vector.shape_cast %79 : vector<8x1x128xf32> to vector<8x128xf32>
    %81 = vector.extract_strided_slice %65 {offsets = [0, 2], sizes = [8, 1], strides = [1, 1]} : vector<8x8xf32> to vector<8x1xf32>
    %82 = vector.broadcast %81 : vector<8x1xf32> to vector<8x128xf32>
    %83 = arith.mulf %80, %82 : vector<8x128xf32>
    %84 = arith.addf %78, %83 : vector<8x128xf32>
    %c0_68 = arith.constant 0 : index
    %c3_69 = arith.constant 3 : index
    %c0_70 = arith.constant 0 : index
    %85 = vector.load %arg1[%c0_68, %c3_69, %c0_70] : memref<8x8x128xf32, #tpu.memory_space<vmem>>, vector<8x1x128xf32>
    %86 = vector.shape_cast %85 : vector<8x1x128xf32> to vector<8x128xf32>
    %87 = vector.extract_strided_slice %65 {offsets = [0, 3], sizes = [8, 1], strides = [1, 1]} : vector<8x8xf32> to vector<8x1xf32>
    %88 = vector.broadcast %87 : vector<8x1xf32> to vector<8x128xf32>
    %89 = arith.mulf %86, %88 : vector<8x128xf32>
    %90 = arith.addf %84, %89 : vector<8x128xf32>
    %c0_71 = arith.constant 0 : index
    %c4_72 = arith.constant 4 : index
    %c0_73 = arith.constant 0 : index
    %91 = vector.load %arg1[%c0_71, %c4_72, %c0_73] : memref<8x8x128xf32, #tpu.memory_space<vmem>>, vector<8x1x128xf32>
    %92 = vector.shape_cast %91 : vector<8x1x128xf32> to vector<8x128xf32>
    %93 = vector.extract_strided_slice %65 {offsets = [0, 4], sizes = [8, 1], strides = [1, 1]} : vector<8x8xf32> to vector<8x1xf32>
    %94 = vector.broadcast %93 : vector<8x1xf32> to vector<8x128xf32>
    %95 = arith.mulf %92, %94 : vector<8x128xf32>
    %96 = arith.addf %90, %95 : vector<8x128xf32>
    %c0_74 = arith.constant 0 : index
    %c5_75 = arith.constant 5 : index
    %c0_76 = arith.constant 0 : index
    %97 = vector.load %arg1[%c0_74, %c5_75, %c0_76] : memref<8x8x128xf32, #tpu.memory_space<vmem>>, vector<8x1x128xf32>
    %98 = vector.shape_cast %97 : vector<8x1x128xf32> to vector<8x128xf32>
    %99 = vector.extract_strided_slice %65 {offsets = [0, 5], sizes = [8, 1], strides = [1, 1]} : vector<8x8xf32> to vector<8x1xf32>
    %100 = vector.broadcast %99 : vector<8x1xf32> to vector<8x128xf32>
    %101 = arith.mulf %98, %100 : vector<8x128xf32>
    %102 = arith.addf %96, %101 : vector<8x128xf32>
    %c0_77 = arith.constant 0 : index
    %c6_78 = arith.constant 6 : index
    %c0_79 = arith.constant 0 : index
    %103 = vector.load %arg1[%c0_77, %c6_78, %c0_79] : memref<8x8x128xf32, #tpu.memory_space<vmem>>, vector<8x1x128xf32>
    %104 = vector.shape_cast %103 : vector<8x1x128xf32> to vector<8x128xf32>
    %105 = vector.extract_strided_slice %65 {offsets = [0, 6], sizes = [8, 1], strides = [1, 1]} : vector<8x8xf32> to vector<8x1xf32>
    %106 = vector.broadcast %105 : vector<8x1xf32> to vector<8x128xf32>
    %107 = arith.mulf %104, %106 : vector<8x128xf32>
    %108 = arith.addf %102, %107 : vector<8x128xf32>
    %c0_80 = arith.constant 0 : index
    %c7_81 = arith.constant 7 : index
    %c0_82 = arith.constant 0 : index
    %109 = vector.load %arg1[%c0_80, %c7_81, %c0_82] : memref<8x8x128xf32, #tpu.memory_space<vmem>>, vector<8x1x128xf32>
    %110 = vector.shape_cast %109 : vector<8x1x128xf32> to vector<8x128xf32>
    %111 = vector.extract_strided_slice %65 {offsets = [0, 7], sizes = [8, 1], strides = [1, 1]} : vector<8x8xf32> to vector<8x1xf32>
    %112 = vector.broadcast %111 : vector<8x1xf32> to vector<8x128xf32>
    %113 = arith.mulf %110, %112 : vector<8x128xf32>
    %114 = arith.addf %108, %113 : vector<8x128xf32>
    %c0_83 = arith.constant 0 : index
    %c0_84 = arith.constant 0 : index
    %115 = vector.load %arg6[%c0_83, %c0_84] : memref<8x128xf32, #tpu.memory_space<vmem>>, vector<8x128xf32>
    tpu.vector_store %arg6[%c0_83, %c0_84], %114 {strides = array<i32>} : memref<8x128xf32, #tpu.memory_space<vmem>>, vector<8x128xf32>,
    return
  }
  func.func @transform_0(%arg0: i32) -> (i32, i32, i32) {
    %c0_i32 = arith.constant 0 : i32
    %c0_i32_0 = arith.constant 0 : i32
    %c0_i32_1 = arith.constant 0 : i32
    return %arg0, %c0_i32, %c0_i32_0 : i32, i32, i32
  }
  func.func @transform_1(%arg0: i32) -> (i32, i32, i32) {
    %c0_i32 = arith.constant 0 : i32
    %c0_i32_0 = arith.constant 0 : i32
    %c0_i32_1 = arith.constant 0 : i32
    %c0_i32_2 = arith.constant 0 : i32
    return %c0_i32, %c0_i32_0, %c0_i32_1 : i32, i32, i32
  }
  func.func @transform_2(%arg0: i32) -> (i32, i32) {
    %c0_i32 = arith.constant 0 : i32
    %c0_i32_0 = arith.constant 0 : i32
    %c0_i32_1 = arith.constant 0 : i32
    return %c0_i32, %c0_i32_0 : i32, i32
  }
  func.func @transform_3(%arg0: i32) -> (i32, i32) {
    %c0_i32 = arith.constant 0 : i32
    %c0_i32_0 = arith.constant 0 : i32
    %c0_i32_1 = arith.constant 0 : i32
    return %c0_i32, %c0_i32_0 : i32, i32
  }
  func.func @transform_4(%arg0: i32) -> (i32, i32) {
    %c0_i32 = arith.constant 0 : i32
    %c0_i32_0 = arith.constant 0 : i32
    %c0_i32_1 = arith.constant 0 : i32
    return %c0_i32, %c0_i32_0 : i32, i32
  }
  func.func @transform_5(%arg0: i32) -> (i32, i32) {
    %c0_i32 = arith.constant 0 : i32
    %c0_i32_0 = arith.constant 0 : i32
    return %arg0, %c0_i32 : i32, i32
  }
}

</mosaic_0001>

<bundles_post_ra>
// kernel: tpu_custom_call.1
= control target key start
LH: loop header
LB: loop body
LE: loop exit
PB: predicated region body
PF: predicated region fallthrough
CT: control target
= control target key end

     0   :  { %10 = vsyncpa [#allocation3], 0  ;;  %s1769_s0 = inlined_call_operand.vmem [shape: f32[8,8,128], index: 0, kind: input, shape index: {}]   ;;  %s1770_s1 = inlined_call_operand.hbm [shape: f32[8,128,128], index: 1, kind: input, shape index: {}]   ;;  %s1771_s2 = inlined_call_operand.vmem [shape: f32[1,128], index: 2, kind: input, shape index: {}]   ;;  %s1772_s3 = inlined_call_operand.vmem [shape: f32[128,8], index: 3, kind: input, shape index: {}]   ;;  %s1773_s4 = inlined_call_operand.vmem [shape: f32[1,8], index: 4, kind: input, shape index: {}]   ;;  %s1774_s5 = inlined_call_operand.hbm [shape: f32[8,128], index: 5, kind: output, shape index: {}]  }
   0x1   :  { %11 = vsyncpa [#allocation4], 0  ;;  %s18_s20 = sshll.u32 %s1770_s1, 4  ;;  %s1053_s21 = smov [#allocation2]   ;;  %s19_s20 = int_to_ptr.hbm [resolvable:$true] %s18_s20 }
   0x2   :  { %s20_s22 = sshll.u32 %s1053_s21, 4  ;;  %s1054_s23 = smov 128   ;;  %s21_s22 = int_to_ptr.vmem [resolvable:$true] %s20_s22 }
   0x3   :  { %s1055_s24 = smov 8  }
   0x4   :  { %26 = dma.hbm_to_vmem [thread:$0]  %s19_s20, 16384, %s21_s22, [#allocation3], %s1054_s23, %s1054_s23, %s1055_s24  }
   0x5   :  { %1049 = dma.done.wait [#allocation3], 16384  }
   0x6   :  { %1050 = vsyncadd [#allocation3], 4294950912  ;;  %v85_v0 = vld [vmem:[#allocation2 + $0xf8] sm:$0xff]  ;;  %v84_v2 = vld [vmem:[#allocation2 + $0xf0] sm:$0xff]  ;;  %vm95_vm0 = vcmask 1041409   ;;  %vm98_vm1 = vcmask 1042434  }
   0x7   :  { %v203_v1 = vld [vmem:[#allocation2 + $0x178] sm:$0xff]  ;;  %116 = vmatpush.msra.mxu0 %v85_v0  ;;  %v202_v4 = vld [vmem:[#allocation2 + $0x170] sm:$0xff]  ;;  %v83_v6 = vld [vmem:[#allocation2 + $0xe8] sm:$0xff]  ;;  %vm101_vm2 = vcmask 1043459   ;;  %vm104_vm3 = vcmask 1044484   ;;  %vm107_vm4 = vcmask 1045509  }
   0x8   :  { %227 = vmatpush.msra.mxu2 %v203_v1  ;;  %v60_v3 = vld [vmem:[#allocation2 + $0x78] sm:$0xff]  ;;  %v59_v7 = vld [vmem:[#allocation2 + $0x70] sm:$0xff]  ;;  %v201_v8 = vld [vmem:[#allocation2 + $0x168] sm:$0xff]  ;;  %vm110_vm5 = vcmask 1046534   ;;  %vm113_vm6 = vcmask 1047559   ;;  %s963_s6 = sshll.u32 %s1774_s5, 4  ;;  %s964_s6 = int_to_ptr.hbm [resolvable:$true] %s963_s6 }
   0x9   :  { %v272_v5 = vld [vmem:[#allocation2 + $0x1f8] sm:$0xff]  ;;  %159 = vmatpush.msra.mxu1 %v60_v3  ;;  %117 = vmatpush.msra.mxu0 %v84_v2  ;;  %v271_v9 = vld [vmem:[#allocation2 + $0x1f0] sm:$0xff]  ;;  %v58_v10 = vld [vmem:[#allocation2 + $0x68] sm:$0xff] }
   0xa   :  { %296 = vmatpush.msra.mxu3 %v272_v5  ;;  %228 = vmatpush.msra.mxu2 %v202_v4  ;;  %v82_v11 = vld [vmem:[#allocation2 + $0xe0] sm:$0xff]  ;;  %v270_v13 = vld [vmem:[#allocation2 + $0x1e8] sm:$0xff]  ;;  %v81_v16 = vld [vmem:[#allocation2 + $0xd8] sm:$0xff] }
   0xb   :  { %160 = vmatpush.msra.mxu1 %v59_v7  ;;  %v200_v12 = vld [vmem:[#allocation2 + $0x160] sm:$0xff]  ;;  %118 = vmatpush.msra.mxu0 %v83_v6  ;;  %v199_v17 = vld [vmem:[#allocation2 + $0x158] sm:$0xff]  ;;  %v80_v20 = vld [vmem:[#allocation2 + $0xd0] sm:$0xff] }
   0xc   :  { %297 = vmatpush.msra.mxu3 %v271_v9  ;;  %229 = vmatpush.msra.mxu2 %v201_v8  ;;  %v57_v14 = vld [vmem:[#allocation2 + $0x60] sm:$0xff]  ;;  %v56_v18 = vld [vmem:[#allocation2 + $0x58] sm:$0xff]  ;;  %v198_v21 = vld [vmem:[#allocation2 + $0x150] sm:$0xff] }
   0xd   :  { %v269_v15 = vld [vmem:[#allocation2 + $0x1e0] sm:$0xff]  ;;  %161 = vmatpush.msra.mxu1 %v58_v10  ;;  %119 = vmatpush.msra.mxu0 %v82_v11  ;;  %v268_v19 = vld [vmem:[#allocation2 + $0x1d8] sm:$0xff]  ;;  %v55_v22 = vld [vmem:[#allocation2 + $0x50] sm:$0xff] }
   0xe   :  { %298 = vmatpush.msra.mxu3 %v270_v13  ;;  %230 = vmatpush.msra.mxu2 %v200_v12  ;;  %v267_v23 = vld [vmem:[#allocation2 + $0x1d0] sm:$0xff]  ;;  %v79_v24 = vld [vmem:[#allocation2 + $0xc8] sm:$0xff]  ;;  %v78_v28 = vld [vmem:[#allocation2 + $0xc0] sm:$0xff] }
   0xf   :  { %162 = vmatpush.msra.mxu1 %v57_v14  ;;  %120 = vmatpush.msra.mxu0 %v81_v16  ;;  %v197_v25 = vld [vmem:[#allocation2 + $0x148] sm:$0xff]  ;;  %v196_v29 = vld [vmem:[#allocation2 + $0x140] sm:$0xff]  ;;  %v77_v32 = vld [vmem:[#allocation2 + $0xb8] sm:$0xff] }
  0x10   :  { %299 = vmatpush.msra.mxu3 %v269_v15  ;;  %231 = vmatpush.msra.mxu2 %v199_v17  ;;  %v54_v26 = vld [vmem:[#allocation2 + $0x48] sm:$0xff]  ;;  %v53_v30 = vld [vmem:[#allocation2 + $0x40] sm:$0xff]  ;;  %v195_v33 = vld [vmem:[#allocation2 + $0x138] sm:$0xff] }
  0x11   :  { %163 = vmatpush.msra.mxu1 %v56_v18  ;;  %121 = vmatpush.msra.mxu0 %v80_v20  ;;  %v266_v27 = vld [vmem:[#allocation2 + $0x1c8] sm:$0xff]  ;;  %v265_v31 = vld [vmem:[#allocation2 + $0x1c0] sm:$0xff]  ;;  %v52_v34 = vld [vmem:[#allocation2 + $0x38] sm:$0xff] }
  0x12   :  { %300 = vmatpush.msra.mxu3 %v268_v19  ;;  %232 = vmatpush.msra.mxu2 %v198_v21  ;;  %v264_v35 = vld [vmem:[#allocation2 + $0x1b8] sm:$0xff]  ;;  %v76_v36 = vld [vmem:[#allocation2 + $0xb0] sm:$0xff]  ;;  %v75_v40 = vld [vmem:[#allocation2 + $0xa8] sm:$0xff] }
  0x13   :  { %164 = vmatpush.msra.mxu1 %v55_v22  ;;  %122 = vmatpush.msra.mxu0 %v79_v24  ;;  %v194_v37 = vld [vmem:[#allocation2 + $0x130] sm:$0xff]  ;;  %v193_v41 = vld [vmem:[#allocation2 + $0x128] sm:$0xff]  ;;  %v74_v44 = vld [vmem:[#allocation2 + $0xa0] sm:$0xff] }
  0x14   :  { %301 = vmatpush.msra.mxu3 %v267_v23  ;;  %233 = vmatpush.msra.mxu2 %v197_v25  ;;  %v51_v38 = vld [vmem:[#allocation2 + $0x30] sm:$0xff]  ;;  %v50_v42 = vld [vmem:[#allocation2 + $0x28] sm:$0xff]  ;;  %v192_v45 = vld [vmem:[#allocation2 + $0x120] sm:$0xff] }
  0x15   :  { %165 = vmatpush.msra.mxu1 %v54_v26  ;;  %123 = vmatpush.msra.mxu0 %v78_v28  ;;  %v263_v39 = vld [vmem:[#allocation2 + $0x1b0] sm:$0xff]  ;;  %v262_v43 = vld [vmem:[#allocation2 + $0x1a8] sm:$0xff]  ;;  %v49_v46 = vld [vmem:[#allocation2 + $0x20] sm:$0xff] }
  0x16   :  { %302 = vmatpush.msra.mxu3 %v266_v27  ;;  %234 = vmatpush.msra.mxu2 %v196_v29  ;;  %v261_v47 = vld [vmem:[#allocation2 + $0x1a0] sm:$0xff]  ;;  %v73_v48 = vld [vmem:[#allocation2 + $0x98] sm:$0xff]  ;;  %v72_v52 = vld [vmem:[#allocation2 + $0x90] sm:$0xff] }
  0x17   :  { %166 = vmatpush.msra.mxu1 %v53_v30  ;;  %124 = vmatpush.msra.mxu0 %v77_v32  ;;  %v191_v49 = vld [vmem:[#allocation2 + $0x118] sm:$0xff]  ;;  %v190_v53 = vld [vmem:[#allocation2 + $0x110] sm:$0xff]  ;;  %v71_v56 = vld [vmem:[#allocation2 + $0x88] sm:$0xff] }
  0x18   :  { %303 = vmatpush.msra.mxu3 %v265_v31  ;;  %235 = vmatpush.msra.mxu2 %v195_v33  ;;  %v48_v50 = vld [vmem:[#allocation2 + $0x18] sm:$0xff]  ;;  %v47_v54 = vld [vmem:[#allocation2 + $0x10] sm:$0xff]  ;;  %v189_v57 = vld [vmem:[#allocation2 + $0x108] sm:$0xff] }
  0x19   :  { %167 = vmatpush.msra.mxu1 %v52_v34  ;;  %125 = vmatpush.msra.mxu0 %v76_v36  ;;  %v260_v51 = vld [vmem:[#allocation2 + $0x198] sm:$0xff]  ;;  %v259_v55 = vld [vmem:[#allocation2 + $0x190] sm:$0xff]  ;;  %v46_v58 = vld [vmem:[#allocation2 + $0x8] sm:$0xff] }
  0x1a   :  { %304 = vmatpush.msra.mxu3 %v264_v35  ;;  %236 = vmatpush.msra.mxu2 %v194_v37  ;;  %v258_v59 = vld [vmem:[#allocation2 + $0x188] sm:$0xff]  ;;  %v70_v60 = vld [vmem:[#allocation2 + $0x80] sm:$0xff]  ;;  %v341_v62 = vld [vmem:[#allocation2 + $0x278] sm:$0xff] }
  0x1b   :  { %168 = vmatpush.msra.mxu1 %v51_v38  ;;  %126 = vmatpush.msra.mxu0 %v75_v40  ;;  %v188_v61 = vld [vmem:[#allocation2 + $0x100] sm:$0xff]  ;;  %v479_v63 = vld [vmem:[#allocation2 + $0x378] sm:$0xff]  ;;  %v340_v2 = vld [vmem:[#allocation2 + $0x270] sm:$0xff] }
  0x1c   :  { %305 = vmatpush.msra.mxu3 %v263_v39  ;;  %237 = vmatpush.msra.mxu2 %v193_v41  ;;  %v45_v0 = vld [vmem:[#allocation2] sm:$0xff]  ;;  %v410_v3 = vld [vmem:[#allocation2 + $0x2f8] sm:$0xff]  ;;  %v478_v4 = vld [vmem:[#allocation2 + $0x370] sm:$0xff] }
  0x1d   :  { %169 = vmatpush.msra.mxu1 %v50_v42  ;;  %127 = vmatpush.msra.mxu0 %v74_v44  ;;  %v257_v1 = vld [vmem:[#allocation2 + $0x180] sm:$0xff]  ;;  %v548_v5 = vld [vmem:[#allocation2 + $0x3f8] sm:$0xff]  ;;  %v339_v6 = vld [vmem:[#allocation2 + $0x268] sm:$0xff] }
  0x1e   :  { %306 = vmatpush.msra.mxu3 %v262_v43  ;;  %238 = vmatpush.msra.mxu2 %v192_v45  ;;  %v409_v7 = vld [vmem:[#allocation2 + $0x2f0] sm:$0xff]  ;;  %v477_v8 = vld [vmem:[#allocation2 + $0x368] sm:$0xff]  ;;  %v338_v10 = vld [vmem:[#allocation2 + $0x260] sm:$0xff] }
  0x1f   :  { %170 = vmatpush.msra.mxu1 %v49_v46  ;;  %128 = vmatpush.msra.mxu0 %v73_v48  ;;  %v547_v9 = vld [vmem:[#allocation2 + $0x3f0] sm:$0xff]  ;;  %v408_v11 = vld [vmem:[#allocation2 + $0x2e8] sm:$0xff]  ;;  %v476_v12 = vld [vmem:[#allocation2 + $0x360] sm:$0xff] }
  0x20   :  { %307 = vmatpush.msra.mxu3 %v261_v47  ;;  %239 = vmatpush.msra.mxu2 %v191_v49  ;;  %v546_v13 = vld [vmem:[#allocation2 + $0x3e8] sm:$0xff]  ;;  %v337_v14 = vld [vmem:[#allocation2 + $0x258] sm:$0xff]  ;;  %v407_v15 = vld [vmem:[#allocation2 + $0x2e0] sm:$0xff] }
  0x21   :  { %171 = vmatpush.msra.mxu1 %v48_v50  ;;  %129 = vmatpush.msra.mxu0 %v72_v52  ;;  %v1101_v16 = vld [vmem:[%s1769_s0 + $0x2] sm:$0x1]  ;;  %v1106_v17 = vld [vmem:[%s1769_s0 + $0xa] sm:$0x1]  ;;  %v475_v18 = vld [vmem:[#allocation2 + $0x358] sm:$0xff] }
  0x22   :  { %308 = vmatpush.msra.mxu3 %v260_v51  ;;  %240 = vmatpush.msra.mxu2 %v190_v53  ;;  %v545_v19 = vld [vmem:[#allocation2 + $0x3e0] sm:$0xff]  ;;  %v1111_v20 = vld [vmem:[%s1769_s0 + $0x12] sm:$0x1]  ;;  %v1116_v21 = vld [vmem:[%s1769_s0 + $0x1a] sm:$0x1]  ;;  %v212_v30 = vrot.slane %v1106_v17, 7 }
  0x23   :  { %172 = vmatpush.msra.mxu1 %v47_v54  ;;  %130 = vmatpush.msra.mxu0 %v71_v56  ;;  %v1121_v22 = vld [vmem:[%s1769_s0 + $0x22] sm:$0x1]  ;;  %v336_v23 = vld [vmem:[#allocation2 + $0x250] sm:$0xff]  ;;  %v1126_v24 = vld [vmem:[%s1769_s0 + $0x2a] sm:$0x1]  ;;  %v214_v31 = vrot.slane %v1111_v20, 6 }
  0x24   :  { %309 = vmatpush.msra.mxu3 %v259_v55  ;;  %241 = vmatpush.msra.mxu2 %v189_v57  ;;  %v1131_v25 = vld [vmem:[%s1769_s0 + $0x32] sm:$0x1]  ;;  %v1136_v26 = vld [vmem:[%s1769_s0 + $0x3a] sm:$0x1]  ;;  %v216_v32 = vrot.slane %v1116_v21, 5  ;;  %v335_v33 = vld [vmem:[#allocation2 + $0x248] sm:$0xff]  ;;  %v213_v41 = vsel %vm95_vm0, %v212_v30, %v1101_v16 }
  0x25   :  { %173 = vmatpush.msra.mxu1 %v46_v58  ;;  %131 = vmatpush.msra.mxu0 %v70_v60  ;;  %v406_v27 = vld [vmem:[#allocation2 + $0x2d8] sm:$0xff]  ;;  %v474_v28 = vld [vmem:[#allocation2 + $0x350] sm:$0xff]  ;;  %v218_v35 = vrot.slane %v1121_v22, 4  ;;  %v220_v36 = vrot.slane %v1126_v24, 3  ;;  %v222_v37 = vrot.slane %v1131_v25, 2  ;;  %v224_v38 = vrot.slane %v1136_v26, 1 }
  0x26   :  { %310 = vmatpush.msra.mxu3 %v258_v59  ;;  %242 = vmatpush.msra.mxu2 %v188_v61  ;;  %v544_v29 = vld [vmem:[#allocation2 + $0x3d8] sm:$0xff]  ;;  %v405_v34 = vld [vmem:[#allocation2 + $0x2d0] sm:$0xff]  ;;  %v473_v39 = vld [vmem:[#allocation2 + $0x348] sm:$0xff]  ;;  %v215_v47 = vsel %vm98_vm1, %v214_v31, %v213_v41 }
  0x27   :  { %365 = vmatpush.msrb.mxu0 %v341_v62  ;;  %174 = vmatpush.msra.mxu1 %v45_v0  ;;  %v543_v40 = vld [vmem:[#allocation2 + $0x3d0] sm:$0xff]  ;;  %v1150_v42 = vld [vmem:[%s1769_s0 + $0x1] sm:$0x1]  ;;  %v1155_v43 = vld [vmem:[%s1769_s0 + $0x9] sm:$0x1]  ;;  %v217_v53 = vsel %vm101_vm2, %v216_v32, %v215_v47 }
  0x28   :  { %503 = vmatpush.msrb.mxu2 %v479_v63  ;;  %311 = vmatpush.msra.mxu3 %v257_v1  ;;  %1798 = vst [vmem:[#allocation8_spill] sm:$0xff] %v1150_v42  ;;  %v1160_v44 = vld [vmem:[%s1769_s0 + $0x11] sm:$0x1]  ;;  %v334_v45 = vld [vmem:[#allocation2 + $0x240] sm:$0xff]  ;;  %v404_v46 = vld [vmem:[#allocation2 + $0x2c8] sm:$0xff]  ;;  %v94_v56 = vrot.slane %v1155_v43, 7  ;;  %v219_v60 = vsel %vm104_vm3, %v218_v35, %v217_v53 }
  0x29   :  { %366 = vmatpush.msrb.mxu0 %v340_v2  ;;  %434 = vmatpush.msrb.mxu1 %v410_v3  ;;  %1799 = vst [vmem:[#allocation9_spill] sm:$0xff] %v1155_v43  ;;  %v1166_v48 = vld [vmem:[%s1769_s0 + $0x19] sm:$0x1]  ;;  %v1171_v49 = vld [vmem:[%s1769_s0 + $0x21] sm:$0x1]  ;;  %v542_v52 = vld [vmem:[#allocation2 + $0x3c8] sm:$0xff]  ;;  %v221_v3 = vsel %vm107_vm4, %v220_v36, %v219_v60 }
  0x2a   :  { %504 = vmatpush.msrb.mxu2 %v478_v4  ;;  %572 = vmatpush.msrb.mxu3 %v548_v5  ;;  %1800 = vst [vmem:[#allocation10_spill] sm:$0xff] %v1160_v44  ;;  %v1176_v50 = vld [vmem:[%s1769_s0 + $0x29] sm:$0x1]  ;;  %v472_v51 = vld [vmem:[#allocation2 + $0x340] sm:$0xff]  ;;  %v1182_v54 = vld [vmem:[%s1769_s0 + $0x31] sm:$0x1]  ;;  %v96_v4 = vsel %vm95_vm0, %v94_v56, %v1150_v42 }
  0x2b   :  { %367 = vmatpush.msrb.mxu0 %v339_v6  ;;  %435 = vmatpush.msrb.mxu1 %v409_v7  ;;  %1801 = vst [vmem:[#allocation11_spill] sm:$0xff] %v1166_v48  ;;  %v1187_v55 = vld [vmem:[%s1769_s0 + $0x39] sm:$0x1]  ;;  %v97_v57 = vrot.slane %v1160_v44, 6  ;;  %v403_v59 = vld [vmem:[#allocation2 + $0x2c0] sm:$0xff]  ;;  %v100_v61 = vrot.slane %v1166_v48, 5 }
  0x2c   :  { %505 = vmatpush.msrb.mxu2 %v477_v8  ;;  %573 = vmatpush.msrb.mxu3 %v547_v9  ;;  %1802 = vst [vmem:[#allocation12_spill] sm:$0xff] %v1171_v49  ;;  %v333_v58 = vld [vmem:[#allocation2 + $0x238] sm:$0xff]  ;;  %v103_v62 = vrot.slane %v1171_v49, 4  ;;  %v106_v63 = vrot.slane %v1176_v50, 3  ;;  %v1198_v0 = vld [vmem:[%s1769_s0 + $0x3] sm:$0x1] }
  0x2d   :  { %368 = vmatpush.msrb.mxu0 %v338_v10  ;;  %436 = vmatpush.msrb.mxu1 %v408_v11  ;;  %1803 = vst [vmem:[#allocation13_spill] sm:$0xff] %v1176_v50  ;;  %v471_v1 = vld [vmem:[#allocation2 + $0x338] sm:$0xff]  ;;  %v541_v2 = vld [vmem:[#allocation2 + $0x3c0] sm:$0xff]  ;;  %v109_v5 = vrot.slane %v1182_v54, 2  ;;  %v112_v6 = vrot.slane %v1187_v55, 1  ;;  %v332_v9 = vld [vmem:[#allocation2 + $0x230] sm:$0xff]  ;;  %v99_v11 = vsel %vm98_vm1, %v97_v57, %v96_v4 }
  0x2e   :  { %506 = vmatpush.msrb.mxu2 %v476_v12  ;;  %574 = vmatpush.msrb.mxu3 %v546_v13  ;;  %1804 = vst [vmem:[#allocation14_spill] sm:$0xff] %v1182_v54  ;;  %v1208_v7 = vld [vmem:[%s1769_s0 + $0xb] sm:$0x1]  ;;  %v1213_v8 = vld [vmem:[%s1769_s0 + $0x13] sm:$0x1]  ;;  %v402_v10 = vld [vmem:[#allocation2 + $0x2b8] sm:$0xff] }
  0x2f   :  { %369 = vmatpush.msrb.mxu0 %v337_v14  ;;  %437 = vmatpush.msrb.mxu1 %v407_v15  ;;  %1805 = vst [vmem:[#allocation15_spill] sm:$0xff] %v1187_v55  ;;  %v1219_v12 = vld [vmem:[%s1769_s0 + $0x1b] sm:$0x1]  ;;  %v1224_v13 = vld [vmem:[%s1769_s0 + $0x23] sm:$0x1]  ;;  %v470_v15 = vld [vmem:[#allocation2 + $0x330] sm:$0xff] }
  0x30   :  { %507 = vmatpush.msrb.mxu2 %v475_v18  ;;  %575 = vmatpush.msrb.mxu3 %v545_v19  ;;  %v1229_v14 = vld [vmem:[%s1769_s0 + $0x2b] sm:$0x1]  ;;  %v223_v18 = vsel %vm110_vm5, %v222_v37, %v221_v3  ;;  %v102_v19 = vsel %vm101_vm2, %v100_v61, %v99_v11  ;;  %v540_v30 = vld [vmem:[#allocation2 + $0x3b8] sm:$0xff]  ;;  %v401_v32 = vld [vmem:[#allocation2 + $0x2b0] sm:$0xff]  ;;  %v287_v35 = vrot.slane %v1224_v13, 4 }
  0x31   :  { %370 = vmatpush.msrb.mxu0 %v336_v23  ;;  %438 = vmatpush.msrb.mxu1 %v406_v27  ;;  %v1236_v23 = vld [vmem:[%s1769_s0 + $0x33] sm:$0x1]  ;;  %v1241_v27 = vld [vmem:[%s1769_s0 + $0x3b] sm:$0x1]  ;;  %v331_v31 = vld [vmem:[#allocation2 + $0x228] sm:$0xff]  ;;  %v289_v36 = vrot.slane %v1229_v14, 3  ;;  %v225_v57 = vsel %vm113_vm6, %v224_v38, %v223_v18 }
  0x32   :  { %508 = vmatpush.msrb.mxu2 %v474_v28  ;;  %576 = vmatpush.msrb.mxu3 %v544_v29  ;;  %1806 = vst [vmem:[#allocation16_spill] sm:$0xff] %v1236_v23  ;;  %v281_v28 = vrot.slane %v1208_v7, 7  ;;  %v283_v29 = vrot.slane %v1213_v8, 6  ;;  %v469_v37 = vld [vmem:[#allocation2 + $0x328] sm:$0xff]  ;;  %v1268_v53 = vld [vmem:[%s1769_s0 + $0x18] sm:$0x1] }
  0x33   :  { %371 = vmatpush.msrb.mxu0 %v335_v33  ;;  %439 = vmatpush.msrb.mxu1 %v405_v34  ;;  %1807 = vst [vmem:[#allocation17_spill] sm:$0xff] %v1241_v27  ;;  %v105_v33 = vsel %vm104_vm3, %v103_v62, %v102_v19  ;;  %v285_v34 = vrot.slane %v1219_v12, 5  ;;  %v1257_v47 = vld [vmem:[%s1769_s0 + $0x8] sm:$0x1]  ;;  %v1273_v56 = vld [vmem:[%s1769_s0 + $0x20] sm:$0x1] }
  0x34   :  { %509 = vmatpush.msrb.mxu2 %v473_v39  ;;  %577 = vmatpush.msrb.mxu3 %v543_v40  ;;  %v539_v39 = vld [vmem:[#allocation2 + $0x3b0] sm:$0xff]  ;;  %v108_v40 = vsel %vm107_vm4, %v106_v63, %v105_v33  ;;  %v282_v41 = vsel %vm95_vm0, %v281_v28, %v1198_v0  ;;  %v1283_v60 = vld [vmem:[%s1769_s0] sm:$0x1]  ;;  %v1288_v61 = vld [vmem:[%s1769_s0 + $0x28] sm:$0x1]  ;;  %v148_v4 = vrot.slane %v1268_v53, 5 }
  0x35   :  { %372 = vmatpush.msrb.mxu0 %v334_v45  ;;  %440 = vmatpush.msrb.mxu1 %v404_v46  ;;  %v291_v45 = vrot.slane %v1236_v23, 2  ;;  %v293_v46 = vrot.slane %v1241_v27, 1  ;;  %v1293_v62 = vld [vmem:[%s1769_s0 + $0x30] sm:$0x1]  ;;  %v330_v38 = vld [vmem:[#allocation2 + $0x220] sm:$0xff]  ;;  %v329_v28 = vld [vmem:[#allocation2 + $0x218] sm:$0xff] }
  0x36   :  { %510 = vmatpush.msrb.mxu2 %v472_v51  ;;  %578 = vmatpush.msrb.mxu3 %v542_v52  ;;  %v284_v51 = vsel %vm98_vm1, %v283_v29, %v282_v41  ;;  %v1263_v52 = vld [vmem:[%s1769_s0 + $0x10] sm:$0x1]  ;;  %v399_v29 = vld [vmem:[#allocation2 + $0x2a0] sm:$0xff]  ;;  %v1400_v23 = vld [vmem:[%s1769_s0 + $0x2e] sm:$0x1] }
  0x37   :  { %373 = vmatpush.msrb.mxu0 %v333_v58  ;;  %441 = vmatpush.msrb.mxu1 %v403_v59  ;;  %v111_v58 = vsel %vm110_vm5, %v109_v5, %v108_v40  ;;  %v286_v59 = vsel %vm101_vm2, %v285_v34, %v284_v51  ;;  %v146_v3 = vrot.slane %v1263_v52, 6  ;;  %v400_v5 = vld [vmem:[#allocation2 + $0x2a8] sm:$0xff]  ;;  %v537_v34 = vld [vmem:[#allocation2 + $0x3a0] sm:$0xff]  ;;  %v466_v41 = vld [vmem:[#allocation2 + $0x310] sm:$0xff]  ;;  %1813 = vst [vmem:[#allocation23_spill] sm:$0xff] %v1400_v23 }
  0x38   :  { %511 = vmatpush.msrb.mxu2 %v471_v1  ;;  %579 = vmatpush.msrb.mxu3 %v541_v2  ;;  %v288_v63 = vsel %vm104_vm3, %v287_v35, %v286_v59  ;;  %v1299_v1 = vld [vmem:[%s1769_s0 + $0x38] sm:$0x1]  ;;  %v144_v2 = vrot.slane %v1257_v47, 7  ;;  %v114_v18 = vsel %vm113_vm6, %v112_v6, %v111_v58  ;;  %v1336_v51 = vld [vmem:[%s1769_s0 + $0x1c] sm:$0x1]  ;;  %v395_v54 = vld [vmem:[#allocation2 + $0x280] sm:$0xff] }
  0x39   :  { %374 = vmatpush.msrb.mxu0 %v332_v9  ;;  %442 = vmatpush.msrb.mxu1 %v402_v10  ;;  %v468_v9 = vld [vmem:[#allocation2 + $0x320] sm:$0xff]  ;;  %v538_v10 = vld [vmem:[#allocation2 + $0x3a8] sm:$0xff]  ;;  %v290_v11 = vsel %vm107_vm4, %v289_v36, %v288_v63  ;;  %v154_v36 = vrot.slane %v1293_v62, 2  ;;  %v156_v6 = vrot.slane %v1299_v1, 1  ;;  %v398_v58 = vld [vmem:[#allocation2 + $0x298] sm:$0xff] }
  0x3a   :  { %512 = vmatpush.msrb.mxu2 %v470_v15  ;;  %580 = vmatpush.msrb.mxu3 %v540_v30  ;;  %v150_v15 = vrot.slane %v1273_v56, 4  ;;  %v292_v19 = vsel %vm110_vm5, %v291_v45, %v290_v11  ;;  %v467_v30 = vld [vmem:[#allocation2 + $0x318] sm:$0xff]  ;;  %v1326_v45 = vld [vmem:[%s1769_s0 + $0xc] sm:$0x1]  ;;  %v354_v11 = vrot.slane %v1336_v51, 5  ;;  %v533_v50 = vld [vmem:[#allocation2 + $0x380] sm:$0xff] }
  0x3b   :  { %375 = vmatpush.msrb.mxu0 %v331_v31  ;;  %443 = vmatpush.msrb.mxu1 %v401_v32  ;;  %v145_v31 = vsel %vm95_vm0, %v144_v2, %v1283_v60  ;;  %v152_v32 = vrot.slane %v1288_v61, 3  ;;  %v294_v33 = vsel %vm113_vm6, %v293_v46, %v292_v19  ;;  %v1331_v46 = vld [vmem:[%s1769_s0 + $0x14] sm:$0x1]  ;;  %v536_v59 = vld [vmem:[#allocation2 + $0x398] sm:$0xff]  ;;  %v1347_v63 = vld [vmem:[%s1769_s0 + $0x2c] sm:$0x1] }
  0x3c   :  { %513 = vmatpush.msrb.mxu2 %v469_v37  ;;  %581 = vmatpush.msrb.mxu3 %v539_v39  ;;  %v147_v35 = vsel %vm98_vm1, %v146_v3, %v145_v31  ;;  %v328_v37 = vld [vmem:[#allocation2 + $0x210] sm:$0xff]  ;;  %v1320_v39 = vld [vmem:[%s1769_s0 + $0x4] sm:$0x1]  ;;  %v465_v19 = vld [vmem:[#allocation2 + $0x308] sm:$0xff] }
  0x3d   :  { %243 = vmatmul.f32.vlgmr.msra.gmra.mxu2 %v225_v57  ;;  %376 = vmatpush.msrb.mxu0 %v330_v38  ;;  %v149_v40 = vsel %vm101_vm2, %v148_v4, %v147_v35  ;;  %v1342_v38 = vld [vmem:[%s1769_s0 + $0x24] sm:$0x1]  ;;  %v1352_v2 = vld [vmem:[%s1769_s0 + $0x34] sm:$0x1]  ;;  %v327_v4 = vld [vmem:[#allocation2 + $0x208] sm:$0xff] }
  0x3e   :  { %444 = vmatpush.msrb.mxu1 %v400_v5  ;;  %514 = vmatpush.msrb.mxu2 %v468_v9  ;;  %v151_v57 = vsel %vm104_vm3, %v150_v15, %v149_v40  ;;  %v1358_v5 = vld [vmem:[%s1769_s0 + $0x3c] sm:$0x1]  ;;  %v350_v9 = vrot.slane %v1326_v45, 7  ;;  %v356_v31 = vrot.slane %v1342_v38, 4  ;;  %v360_v40 = vrot.slane %v1352_v2, 2 }
  0x3f   :  { %582 = vmatpush.msrb.mxu3 %v538_v10  ;;  %132 = vmatmul.f32.vlgmr.msra.gmra.mxu0 %v114_v18  ;;  %v153_v3 = vsel %vm107_vm4, %v152_v32, %v151_v57  ;;  %v352_v10 = vrot.slane %v1331_v46, 6  ;;  %v397_v18 = vld [vmem:[#allocation2 + $0x290] sm:$0xff]  ;;  %v358_v32 = vrot.slane %v1347_v63, 3  ;;  %v362_v57 = vrot.slane %v1358_v5, 1  ;;  %v1395_v27 = vld [vmem:[%s1769_s0 + $0x26] sm:$0x1] }
  0x40   :  { %312 = vmatmul.f32.vlgmr.msra.gmra.mxu3 %v294_v33  ;;  %377 = vmatpush.msrb.mxu0 %v329_v28  ;;  %v155_v15 = vsel %vm110_vm5, %v154_v36, %v153_v3  ;;  %v535_v28 = vld [vmem:[#allocation2 + $0x390] sm:$0xff]  ;;  %v1369_v33 = vld [vmem:[%s1769_s0 + $0x6] sm:$0x1]  ;;  %v351_v36 = vsel %vm95_vm0, %v350_v9, %v1320_v39  ;;  %v1379_v3 = vld [vmem:[%s1769_s0 + $0xe] sm:$0x1]  ;;  %1812 = vst [vmem:[#allocation22_spill] sm:$0xff] %v1395_v27 }
  0x41   :  { %445 = vmatpush.msrb.mxu1 %v399_v29  ;;  %515 = vmatpush.msrb.mxu2 %v467_v30  ;;  %1808 = vst [vmem:[#allocation18_spill] sm:$0xff] %v1369_v33  ;;  %v157_v35 = vsel %vm113_vm6, %v156_v6, %v155_v15  ;;  %v326_v29 = vld [vmem:[#allocation2 + $0x200] sm:$0xff]  ;;  %v396_v6 = vld [vmem:[#allocation2 + $0x288] sm:$0xff]  ;;  %v353_v9 = vsel %vm98_vm1, %v352_v10, %v351_v36  ;;  %v1390_v15 = vld [vmem:[%s1769_s0 + $0x1e] sm:$0x1]  ;;  %v488_v36 = vrot.slane %v1379_v3, 7 }
  0x42   :  { %583 = vmatpush.msrb.mxu3 %v537_v34  ;;  %378 = vmatpush.msrb.mxu0 %v328_v37  ;;  %v464_v30 = vld [vmem:[#allocation2 + $0x300] sm:$0xff]  ;;  %1809 = vst [vmem:[#allocation19_spill] sm:$0xff] %v1379_v3  ;;  %v1384_v34 = vld [vmem:[%s1769_s0 + $0x16] sm:$0x1]  ;;  %v534_v37 = vld [vmem:[#allocation2 + $0x388] sm:$0xff] }
  0x43   :  { %1810 = vst [vmem:[#allocation20_spill] sm:$0xff] %v1384_v34  ;;  %175 = vmatmul.f32.vlgmr.msra.gmra.mxu1 %v157_v35  ;;  %516 = vmatpush.msrb.mxu2 %v466_v41  ;;  %v355_v41 = vsel %vm101_vm2, %v354_v11, %v353_v9  ;;  %v1406_v10 = vld [vmem:[%s1769_s0 + $0x36] sm:$0x1]  ;;  %v1411_v35 = vld [vmem:[%s1769_s0 + $0x3e] sm:$0x1]  ;;  %v490_v55 = vrot.slane %v1384_v34, 6 }
  0x44   :  { %1811 = vst [vmem:[#allocation21_spill] sm:$0xff] %v1390_v15  ;;  %446 = vmatpush.msrb.mxu1 %v398_v58  ;;  %584 = vmatpush.msrb.mxu3 %v536_v59  ;;  %v357_v58 = vsel %vm104_vm3, %v356_v31, %v355_v41  ;;  %v492_v59 = vrot.slane %v1390_v15, 5  ;;  %v494_v11 = vrot.slane %v1395_v27, 4  ;;  %v496_v9 = vrot.slane %v1400_v23, 3  ;;  %v1422_v49 = vld [vmem:[%s1769_s0 + $0x5] sm:$0x1] }
  0x45   :  { %1814 = vst [vmem:[#allocation24_spill] sm:$0xff] %v1406_v10  ;;  %379 = vmatpush.msrb.mxu0 %v327_v4  ;;  %517 = vmatpush.msrb.mxu2 %v465_v19  ;;  %v359_v4 = vsel %vm107_vm4, %v358_v32, %v357_v58  ;;  %v489_v19 = vsel %vm95_vm0, %v488_v36, %v1369_v33  ;;  %v498_v31 = vrot.slane %v1406_v10, 2  ;;  %v500_v41 = vrot.slane %v1411_v35, 1  ;;  %v1432_v23 = vld [vmem:[%s1769_s0 + $0xd] sm:$0x1] }
  0x46   :  { %1815 = vst [vmem:[#allocation25_spill] sm:$0xff] %v1411_v35  ;;  %447 = vmatpush.msrb.mxu1 %v397_v18  ;;  %585 = vmatpush.msrb.mxu3 %v535_v28  ;;  %v1437_v27 = vld [vmem:[%s1769_s0 + $0x15] sm:$0x1]  ;;  %v614_v18 = vld [vmem:[%s1772_s3 + $0x78] sm:$0xff]  ;;  %v361_v28 = vsel %vm110_vm5, %v360_v40, %v359_v4  ;;  %v491_v32 = vsel %vm98_vm1, %v490_v55, %v489_v19  ;;  %v1452_v58 = vld [vmem:[%s1769_s0 + $0x25] sm:$0x1] }
  0x47   :  { %380 = vmatpush.msrb.mxu0 %v326_v29  ;;  %518 = vmatpush.msrb.mxu2 %v464_v30  ;;  %v1447_v36 = vld [vmem:[%s1769_s0 + $0x1d] sm:$0x1]  ;;  %v1457_v35 = vld [vmem:[%s1769_s0 + $0x2d] sm:$0x1]  ;;  %v363_v29 = vsel %vm113_vm6, %v362_v57, %v361_v28  ;;  %v493_v55 = vsel %vm101_vm2, %v492_v59, %v491_v32  ;;  %v1464_v30 = vld [vmem:[%s1769_s0 + $0x35] sm:$0x1] }
  0x48   :  { %448 = vmatpush.msrb.mxu1 %v396_v6  ;;  %586 = vmatpush.msrb.mxu3 %v534_v37  ;;  %v1469_v40 = vld [vmem:[%s1769_s0 + $0x3d] sm:$0x1]  ;;  %v419_v4 = vrot.slane %v1432_v23, 7  ;;  %v421_v19 = vrot.slane %v1437_v27, 6  ;;  %v495_v6 = vsel %vm104_vm3, %v494_v11, %v493_v55  ;;  %v423_v57 = vrot.slane %v1447_v36, 5  ;;  %v613_v32 = vld [vmem:[%s1772_s3 + $0x70] sm:$0xff] }
  0x49   :  { %381 = vmatmul.f32.vlgmr.msrb.gmra.mxu0 %v363_v29  ;;  %v425_v37 = vrot.slane %v1452_v58, 4  ;;  %v427_v59 = vrot.slane %v1457_v35, 3  ;;  %v1480_v28 = vld [vmem:[%s1769_s0 + $0x7] sm:$0x1]  ;;  %v497_v10 = vsel %vm107_vm4, %v496_v9, %v495_v6  ;;  %v429_v29 = vrot.slane %v1464_v30, 2  ;;  %v612_v33 = vld [vmem:[%s1772_s3 + $0x68] sm:$0xff] }
  0x4a   :  { %449 = vmatpush.msrb.mxu1 %v395_v54  ;;  %587 = vmatpush.msrb.mxu3 %v533_v50  ;;  %v420_v11 = vsel %vm95_vm0, %v419_v4, %v1422_v49  ;;  %v431_v55 = vrot.slane %v1469_v40, 1  ;;  %v1493_v15 = vld [vmem:[%s1769_s0 + $0xf] sm:$0x1]  ;;  %v1498_v34 = vld [vmem:[%s1769_s0 + $0x17] sm:$0x1]  ;;  %v499_v54 = vsel %vm110_vm5, %v498_v31, %v497_v10 }
  0x4b   :  { %v422_v50 = vsel %vm98_vm1, %v421_v19, %v420_v11  ;;  %v1505_v9 = vld [vmem:[%s1769_s0 + $0x1f] sm:$0x1]  ;;  %v1510_v4 = vld [vmem:[%s1769_s0 + $0x27] sm:$0x1]  ;;  %v1515_v6 = vld [vmem:[%s1769_s0 + $0x2f] sm:$0x1]  ;;  %619 = vmatpush.msra.mxu0 %v614_v18  ;;  %v501_v10 = vsel %vm113_vm6, %v500_v41, %v499_v54 }
  0x4c   :  { %1816 = vst [vmem:[#allocation26_spill] sm:$0xff] %v1515_v6  ;;  %v424_v31 = vsel %vm101_vm2, %v423_v57, %v422_v50  ;;  %v1522_v19 = vld [vmem:[%s1769_s0 + $0x37] sm:$0x1]  ;;  %v557_v11 = vrot.slane %v1493_v15, 7  ;;  %v559_v3 = vrot.slane %v1498_v34, 6  ;;  %519 = vmatmul.f32.vlgmr.msrb.gmra.mxu2 %v501_v10  ;;  %v561_v57 = vrot.slane %v1505_v9, 5 }
  0x4d   :  { %1817 = vst [vmem:[#allocation27_spill] sm:$0xff] %v1522_v19  ;;  %v426_v18 = vsel %vm104_vm3, %v425_v37, %v424_v31  ;;  %v1533_v41 = vld [vmem:[%s1769_s0 + $0x3f] sm:$0x1]  ;;  %v563_v54 = vrot.slane %v1510_v4, 4  ;;  %620 = vmatpush.msra.mxu0 %v613_v32  ;;  %v565_v44 = vrot.slane %v1515_v6, 3  ;;  %v611_v37 = vld [vmem:[%s1772_s3 + $0x60] sm:$0xff] }
  0x4e   :  { %1818 = vst [vmem:[#allocation28_spill] sm:$0xff] %v1533_v41  ;;  %v428_v50 = vsel %vm107_vm4, %v427_v59, %v426_v18  ;;  %v558_v48 = vsel %vm95_vm0, %v557_v11, %v1480_v28  ;;  %v567_v43 = vrot.slane %v1522_v19, 2  ;;  %v569_v18 = vrot.slane %v1533_v41, 1 }
  0x4f   :  { %v430_v10 = vsel %vm110_vm5, %v429_v29, %v428_v50  ;;  %v560_v31 = vsel %vm98_vm1, %v559_v3, %v558_v48  ;;  %621 = vmatpush.msra.mxu0 %v612_v33  ;;  %v610_v48 = vld [vmem:[%s1772_s3 + $0x58] sm:$0xff]  ;;  %v609_v33 = vld [vmem:[%s1772_s3 + $0x50] sm:$0xff]  ;;  %v608_v3 = vld [vmem:[%s1772_s3 + $0x48] sm:$0xff] }
  0x50   :  { %v432_v32 = vsel %vm113_vm6, %v431_v55, %v430_v10  ;;  %v562_v59 = vsel %vm101_vm2, %v561_v57, %v560_v31  ;;  %v604_v55 = vld [vmem:[%s1772_s3 + $0x28] sm:$0xff]  ;;  %v602_v57 = vld [vmem:[%s1772_s3 + $0x18] sm:$0xff] }
  0x51   :  { %450 = vmatmul.f32.vlgmr.msrb.gmra.mxu1 %v432_v32  ;;  %v564_v11 = vsel %vm104_vm3, %v563_v54, %v562_v59  ;;  %622 = vmatpush.msra.mxu0 %v611_v37  ;;  %v601_v54 = vld [vmem:[%s1772_s3 + $0x10] sm:$0xff]  ;;  %v600_v50 = vld [vmem:[%s1772_s3 + $0x8] sm:$0xff]  ;;  %v599_v37 = vld [vmem:[%s1772_s3] sm:$0xff] }
  0x52   :  { %v566_v6 = vsel %vm107_vm4, %v565_v44, %v564_v11  ;;  %v605_v44 = vld [vmem:[%s1772_s3 + $0x30] sm:$0xff] }
  0x53   :  { %v568_v42 = vsel %vm110_vm5, %v567_v43, %v566_v6  ;;  %623 = vmatpush.msra.mxu0 %v610_v48  ;;  %v606_v43 = vld [vmem:[%s1772_s3 + $0x38] sm:$0xff]  ;;  %v603_v6 = vld [vmem:[%s1772_s3 + $0x20] sm:$0xff] }
  0x54   :  { %v570_v29 = vsel %vm113_vm6, %v569_v18, %v568_v42  ;;  %v607_v42 = vld [vmem:[%s1772_s3 + $0x40] sm:$0xff] }
  0x55   :  { %588 = vmatmul.f32.vlgmr.msrb.gmra.mxu3 %v570_v29  ;;  %624 = vmatpush.msra.mxu0 %v609_v33 }
  0x57   :  { %625 = vmatpush.msra.mxu0 %v608_v3 }
  0x59   :  { %626 = vmatpush.msra.mxu0 %v607_v42 }
  0x5b   :  { %627 = vmatpush.msra.mxu0 %v606_v43 }
  0x5d   :  { %628 = vmatpush.msra.mxu0 %v605_v44 }
  0x5f   :  { %629 = vmatpush.msra.mxu0 %v604_v55  ;;  %v995_v55 = vld [vmem:[%s1771_s2] ss:$0 sm:$0xff]  ;;  %s1064_s2 = smov [#allocation5]  }
  0x61   :  { %630 = vmatpush.msra.mxu0 %v603_v6 }
  0x63   :  { %631 = vmatpush.msra.mxu0 %v602_v57 }
  0x65   :  { %632 = vmatpush.msra.mxu0 %v601_v54 }
  0x67   :  { %633 = vmatpush.msra.mxu0 %v600_v50 }
  0x69   :  { %634 = vmatpush.msra.mxu0 %v599_v37  ;;  %v996_v37 = vld [vmem:[%s1773_s4] ss:$0 sm:$0xff]  ;;  %s961_s4 = sshll.u32 %s1064_s2, 4  ;;  %s962_s4 = int_to_ptr.vmem [resolvable:$true] %s961_s4 }
  0xbc   :  { %v133_v31 = vpop.f32.mrf.mxu0 }
  0xc0   :  { %v176_v10 = vpop.f32.mrf.mxu1  ;;  %v244_v59 = vpop.f32.mrf.mxu2 }
  0xc1   :  { %v177_v32 = vadd.f32 %v176_v10, %v133_v31  ;;  %v1056_v31 = vmov 4  }
  0xc2   :  { %990 = vset.pattern.permute.xlu2 %v1056_v31  ;;  %v1060_v31 = vmov 3  }
  0xc3   :  { %v247_v18 = vadd.f32 %v244_v59, %v177_v32  ;;  %v313_v11 = vpop.f32.mrf.mxu3  ;;  %v1057_v32 = vmov 2  }
  0xc4   :  { %988 = vset.pattern.permute.xlu1 %v1057_v32  ;;  %v1061_v32 = vmov 1  }
  0xc5   :  { %v316_v29 = vadd.f32 %v313_v11, %v247_v18  ;;  %v1058_v18 = vmov 0  }
  0xc6   :  { %v382_v48 = vpop.f32.mrf.mxu0  ;;  %986 = vset.pattern.permute.xlu0 %v1058_v18  ;;  %v1063_v18 = vmov 6  }
  0xc7   :  { %v385_v33 = vadd.f32 %v382_v48, %v316_v29 }
  0xce   :  { %v451_v3 = vpop.f32.mrf.mxu1 }
  0xcf   :  { %v520_v42 = vpop.f32.mrf.mxu2  ;;  %v454_v43 = vadd.f32 %v451_v3, %v385_v33 }
  0xd1   :  { %v523_v44 = vadd.f32 %v520_v42, %v454_v43 }
  0xd8   :  { %v589_v6 = vpop.f32.mrf.mxu3 }
  0xd9   :  { %v592_v57 = vadd.f32 %v589_v6, %v523_v44 }
  0xdb   :  { %v597_v54 = vadd.f32 %v995_v55, %v592_v57 }
  0xdd   :  { %v598_v50 = vmax.f32 %v597_v54, 0.0 }
  0xdf   :  { %635 = vmatmul.f32.vlgmr.msra.gmra.mxu0 %v598_v50 }
 0x15c   :  { %v636_v10 = vpop.f32.mrf.mxu0 }
 0x15d   :  { %v637_v59 = vadd.f32 %v996_v37, %v636_v10  ;;  %v1059_v10 = vmov 5  }
 0x15f   :  { %v973_v11 = vmul.f32 -1.442695, %v637_v59  ;;  %v1062_v59 = vmov 7  }
 0x161   :  { %997 = vpow2.f32 %v973_v11 }
 0x167   :  { %v998_v29 = vpop.eup %997 }
 0x168   :  { %v642_v48 = vadd.f32 1.0, %v998_v29 }
 0x16a   :  { %999 = vrcp.f32 %v642_v48  ;;  %v654_v43 = vand.u32 2147483648, %v642_v48  ;;  %v652_v55 = vand.u32 2147483647, %v642_v48  ;;  %vm648_vm8 = vweird.f32 %v642_v48 }
 0x16c   :  { %v655_v57 = vor.u32 1.1754944e-38, %v654_v43  ;;  %vm653_vm10 = vcmp.eq.f32.partialorder %v652_v55, 8.507059e+37 }
 0x170   :  { %v1000_v33 = vpop.eup %999 }
 0x171   :  { %v644_v3 = vmul.f32 %v1000_v33, %v642_v48  ;;  %vm649_vm7 = vweird.f32 %v1000_v33 }
 0x172   :  { %vm650_vm9 = vmor %vm648_vm8, %vm649_vm7 }
 0x173   :  { %v645_v42 = vsub.f32 1.0, %v644_v3 }
 0x175   :  { %v646_v44 = vmul.f32 %v1000_v33, %v645_v42 }
 0x177   :  { %v647_v6 = vadd.f32 %v1000_v33, %v646_v44 }
 0x179   :  { %v651_v54 = vsel %vm650_vm9, %v1000_v33, %v647_v6 }
 0x17a   :  { %v656_v50 = vsel %vm653_vm10, %v655_v57, %v651_v54 }
 0x17b   :  { %v658_v37 = vmul.f32 0.125, %v656_v50 }
 0x17d   :  { %797 = vperm.xlu2 %990, %v658_v37   ;;  %729 = vperm.xlu1 %988, %v658_v37  }
 0x17e   :  { %661 = vperm.xlu0 %986, %v658_v37  }
 0x185   :  { %991 = vset.pattern.permute.xlu2 %v1059_v10  ;;  %989 = vset.pattern.permute.xlu1 %v1060_v31 }
 0x186   :  { %987 = vset.pattern.permute.xlu0 %v1061_v32  ;;  %831 = vperm.xlu2 %991, %v658_v37  }
 0x187   :  { %763 = vperm.xlu1 %989, %v658_v37   ;;  %695 = vperm.xlu0 %987, %v658_v37  }
 0x18e   :  { %993 = vset.pattern.permute.xlu2 %v1062_v59 }
 0x18f   :  { %992 = vset.pattern.permute.xlu1 %v1063_v18  ;;  %899 = vperm.xlu2 %993, %v658_v37  }
 0x190   :  { %865 = vperm.xlu1 %992, %v658_v37   ;;  %994 = vset.pattern.permute.xlu0 %v1062_v59 }
 0x1d7   :  { %v798_v11 = vpop.permute.xlu2 %797 }
 0x1d8   :  { %v799_v48 = vrot.slane %v798_v11, 1  ;;  %v800_v33 = vrot.slane %v798_v11, 2  ;;  %v801_v3 = vrot.slane %v798_v11, 3  ;;  %v802_v42 = vrot.slane %v798_v11, 4 }
 0x1d9   :  { %v803_v43 = vrot.slane %v798_v11, 5  ;;  %v804_v44 = vrot.slane %v798_v11, 6  ;;  %v1597_v55 = vmul.f32 %v798_v11, %v1320_v39  ;;  %v805_v6 = vrot.slane %v798_v11, 7 }
 0x1da   :  { %v1600_v57 = vmul.f32 %v799_v48, %v1326_v45  ;;  %v1603_v54 = vmul.f32 %v800_v33, %v1331_v46  ;;  %v1608_v31 = vmul.f32 %v801_v3, %v1336_v51  ;;  %v1611_v39 = vmul.f32 %v802_v42, %v1342_v38 }
 0x1db   :  { %v1614_v11 = vmul.f32 %v803_v43, %v1347_v63  ;;  %v1619_v41 = vmul.f32 %v804_v44, %v1352_v2  ;;  %v1622_v51 = vmul.f32 %v805_v6, %v1358_v5 }
 0x1dd   :  { %1820 = vst [vmem:[#allocation30_spill] sm:$0xff] %v1619_v41 }
 0x1de   :  { %1821 = vst [vmem:[#allocation31_spill] sm:$0xff] %v1622_v51 }
 0x1e0   :  { %v832_v29 = vpop.permute.xlu2 %831 }
 0x1e1   :  { %v833_v50 = vrot.slane %v832_v29, 1  ;;  %v834_v37 = vrot.slane %v832_v29, 2  ;;  %v835_v32 = vrot.slane %v832_v29, 3  ;;  %v836_v59 = vrot.slane %v832_v29, 4 }
 0x1e2   :  { %v837_v18 = vrot.slane %v832_v29, 5  ;;  %v838_v45 = vrot.slane %v832_v29, 6  ;;  %v839_v48 = vrot.slane %v832_v29, 7  ;;  %v1625_v3 = vmul.f32 %v832_v29, %v1422_v49 }
 0x1e3   :  { %v1628_v38 = vmul.f32 %v833_v50, %v1432_v23  ;;  %v1631_v63 = vmul.f32 %v834_v37, %v1437_v27  ;;  %v1635_v43 = vmul.f32 %v835_v32, %v1447_v36  ;;  %v1638_v2 = vmul.f32 %v836_v59, %v1452_v58 }
 0x1e4   :  { %v1642_v49 = vmul.f32 %v837_v18, %v1457_v35  ;;  %v1647_v6 = vmul.f32 %v838_v45, %v1464_v30  ;;  %v1650_v36 = vmul.f32 %v839_v48, %v1469_v40 }
 0x1e5   :  { %1822 = vst [vmem:[#allocation32_spill] sm:$0xff] %v1638_v2 }
 0x1e6   :  { %1823 = vst [vmem:[#allocation33_spill] sm:$0xff] %v1642_v49 }
 0x1e7   :  { %1824 = vst [vmem:[#allocation34_spill] sm:$0xff] %v1647_v6 }
 0x1e8   :  { %1825 = vst [vmem:[#allocation35_spill] sm:$0xff] %v1650_v36 }
 0x1e9   :  { %v1605_v10 = vpop.permute.xlu2 %899 }
 0x1ea   :  { %1819 = vst [vmem:[#allocation29_spill] sm:$0xff] %v1605_v10  ;;  %v901_v46 = vrot.slane %v1605_v10, 1  ;;  %v902_v33 = vrot.slane %v1605_v10, 2  ;;  %v903_v42 = vrot.slane %v1605_v10, 3  ;;  %v904_v5 = vrot.slane %v1605_v10, 4 }
 0x1eb   :  { %v1654_v58 = vmul.f32 %v1605_v10, %v1480_v28 }
 0x1ec   :  { %v1657_v50 = vmul.f32 %v901_v46, %v1493_v15  ;;  %v1660_v35 = vmul.f32 %v902_v33, %v1498_v34  ;;  %v1664_v32 = vmul.f32 %v903_v42, %v1505_v9  ;;  %v1667_v40 = vmul.f32 %v904_v5, %v1510_v4 }
 0x1ee   :  { %1826 = vst [vmem:[#allocation36_spill] sm:$0xff] %v1660_v35 }
 0x1ef   :  { %v730_v44 = vpop.permute.xlu1 %729  ;;  %1827 = vst [vmem:[#allocation37_spill] sm:$0xff] %v1664_v32 }
 0x1f0   :  { %v662_v27 = vpop.permute.xlu0 %661  ;;  %v731_v30 = vrot.slane %v730_v44, 1  ;;  %v732_v59 = vrot.slane %v730_v44, 2  ;;  %v733_v18 = vrot.slane %v730_v44, 3  ;;  %1828 = vst [vmem:[#allocation38_spill] sm:$0xff] %v1667_v40  ;;  %v734_v45 = vrot.slane %v730_v44, 4 }
 0x1f1   :  { %v735_v28 = vrot.slane %v730_v44, 5  ;;  %v736_v48 = vrot.slane %v730_v44, 6  ;;  %v663_v29 = vrot.slane %v662_v27, 1  ;;  %v664_v15 = vrot.slane %v662_v27, 2 }
 0x1f2   :  { %v665_v46 = vrot.slane %v662_v27, 3  ;;  %v666_v23 = vrot.slane %v662_v27, 4  ;;  %v737_v34 = vrot.slane %v730_v44, 7  ;;  %v667_v33 = vrot.slane %v662_v27, 5 }
 0x1f3   :  { %v668_v19 = vrot.slane %v662_v27, 6  ;;  %v669_v37 = vrot.slane %v662_v27, 7  ;;  %v746_v9 = vmul.f32 %v730_v44, %v1101_v16  ;;  %v747_v42 = vmul.f32 %v731_v30, %v1106_v17 }
 0x1f4   :  { %v748_v10 = vmul.f32 %v732_v59, %v1111_v20  ;;  %v749_v4 = vmul.f32 %v733_v18, %v1116_v21  ;;  %v750_v5 = vmul.f32 %v734_v45, %v1121_v22  ;;  %v751_v40 = vmul.f32 %v735_v28, %v1126_v24 }
 0x1f5   :  { %v752_v36 = vmul.f32 %v736_v48, %v1131_v25  ;;  %v678_v6 = vmul.f32 %v662_v27, %v1283_v60  ;;  %v679_v32 = vmul.f32 %v663_v29, %v1257_v47  ;;  %v680_v49 = vmul.f32 %v664_v15, %v1263_v52  ;;  %v1829_v15 = vld [vmem:[#allocation8_spill] sm:$0xff] }
 0x1f6   :  { %v681_v16 = vmul.f32 %v665_v46, %v1268_v53  ;;  %v682_v17 = vmul.f32 %v666_v23, %v1273_v56  ;;  %v683_v20 = vmul.f32 %v667_v33, %v1288_v61  ;;  %v684_v21 = vmul.f32 %v668_v19, %v1293_v62  ;;  %v1830_v46 = vld [vmem:[#allocation9_spill] sm:$0xff]  ;;  %v1832_v33 = vld [vmem:[#allocation11_spill] sm:$0xff] }
 0x1f7   :  { %v685_v22 = vmul.f32 %v669_v37, %v1299_v1  ;;  %v1687_v24 = vmul.f32 %v737_v34, %v1136_v26  ;;  %v1831_v34 = vld [vmem:[#allocation10_spill] sm:$0xff] }
 0x1f9   :  { %v1681_v44 = vpop.permute.xlu1 %763  ;;  %v696_v56 = vpop.permute.xlu0 %695 }
 0x1fa   :  { %v765_v25 = vrot.slane %v1681_v44, 1  ;;  %v766_v47 = vrot.slane %v1681_v44, 2  ;;  %v767_v52 = vrot.slane %v1681_v44, 3  ;;  %v768_v53 = vrot.slane %v1681_v44, 4 }
 0x1fb   :  { %v769_v60 = vrot.slane %v1681_v44, 5  ;;  %v780_v1 = vmul.f32 %v1681_v44, %v1198_v0  ;;  %v697_v37 = vrot.slane %v696_v56, 1  ;;  %v698_v30 = vrot.slane %v696_v56, 2 }
 0x1fc   :  { %v781_v26 = vmul.f32 %v765_v25, %v1208_v7  ;;  %v782_v19 = vmul.f32 %v766_v47, %v1213_v8  ;;  %v783_v23 = vmul.f32 %v767_v52, %v1219_v12  ;;  %v784_v29 = vmul.f32 %v768_v53, %v1224_v13  ;;  %v1833_v25 = vld [vmem:[#allocation12_spill] sm:$0xff]  ;;  %v1834_v47 = vld [vmem:[#allocation13_spill] sm:$0xff]  ;;  %v1835_v52 = vld [vmem:[#allocation14_spill] sm:$0xff] }
 0x1fd   :  { %v1703_v27 = vmul.f32 %v769_v60, %v1229_v14  ;;  %v699_v59 = vrot.slane %v696_v56, 3  ;;  %v700_v18 = vrot.slane %v696_v56, 4  ;;  %v701_v45 = vrot.slane %v696_v56, 5  ;;  %v1836_v60 = vld [vmem:[#allocation15_spill] sm:$0xff] }
 0x1fe   :  { %v702_v28 = vrot.slane %v696_v56, 6  ;;  %v703_v48 = vrot.slane %v696_v56, 7  ;;  %v712_v0 = vmul.f32 %v696_v56, %v1829_v15  ;;  %v713_v7 = vmul.f32 %v697_v37, %v1830_v46 }
 0x1ff   :  { %v714_v8 = vmul.f32 %v698_v30, %v1831_v34  ;;  %v715_v12 = vmul.f32 %v699_v59, %v1832_v33  ;;  %v716_v13 = vmul.f32 %v700_v18, %v1833_v25  ;;  %v717_v14 = vmul.f32 %v701_v45, %v1834_v47 }
 0x200   :  { %v718_v53 = vmul.f32 %v702_v28, %v1835_v52  ;;  %v719_v62 = vmul.f32 %v703_v48, %v1836_v60  ;;  %v720_v61 = vadd.f32 %v712_v0, %v678_v6  ;;  %v721_v51 = vadd.f32 %v713_v7, %v679_v32  ;;  %v1843_v0 = vld [vmem:[#allocation16_spill] sm:$0xff] }
 0x201   :  { %v722_v35 = vadd.f32 %v714_v8, %v680_v49  ;;  %v723_v2 = vadd.f32 %v715_v12, %v681_v16  ;;  %v724_v41 = vadd.f32 %v716_v13, %v682_v17  ;;  %v725_v56 = vadd.f32 %v717_v14, %v683_v20  ;;  %v1845_v8 = vld [vmem:[#allocation17_spill] sm:$0xff] }
 0x202   :  { %v726_v15 = vadd.f32 %v718_v53, %v684_v21  ;;  %v727_v37 = vadd.f32 %v719_v62, %v685_v22  ;;  %v866_v46 = vpop.permute.xlu1 %865  ;;  %v754_v30 = vadd.f32 %v746_v9, %v720_v61  ;;  %v755_v34 = vadd.f32 %v747_v42, %v721_v51  ;;  %v1839_v22 = vld [vmem:[#allocation20_spill] sm:$0xff]  ;;  %v1840_v61 = vld [vmem:[#allocation21_spill] sm:$0xff]  ;;  %v1841_v62 = vld [vmem:[#allocation22_spill] sm:$0xff] }
 0x203   :  { %v756_v59 = vadd.f32 %v748_v10, %v722_v35  ;;  %v757_v33 = vadd.f32 %v749_v4, %v723_v2  ;;  %v758_v18 = vadd.f32 %v750_v5, %v724_v41  ;;  %v759_v25 = vadd.f32 %v751_v40, %v725_v56  ;;  %v1838_v40 = vld [vmem:[#allocation19_spill] sm:$0xff] }
 0x204   :  { %v760_v45 = vadd.f32 %v752_v36, %v726_v15  ;;  %v867_v47 = vrot.slane %v866_v46, 1  ;;  %v788_v28 = vadd.f32 %v780_v1, %v754_v30  ;;  %v789_v52 = vadd.f32 %v781_v26, %v755_v34  ;;  %v1837_v36 = vld [vmem:[#allocation18_spill] sm:$0xff]  ;;  %v1842_v1 = vld [vmem:[#allocation23_spill] sm:$0xff]  ;;  %v1847_v30 = vld [vmem:[#allocation24_spill] sm:$0xff] }
 0x205   :  { %v790_v48 = vadd.f32 %v782_v19, %v756_v59  ;;  %v791_v6 = vadd.f32 %v783_v23, %v757_v33  ;;  %v792_v32 = vadd.f32 %v784_v29, %v758_v18  ;;  %v868_v49 = vrot.slane %v866_v46, 2  ;;  %v1848_v33 = vld [vmem:[#allocation30_spill] sm:$0xff] }
 0x206   :  { %v869_v16 = vrot.slane %v866_v46, 3  ;;  %v870_v17 = vrot.slane %v866_v46, 4  ;;  %v822_v20 = vadd.f32 %v1597_v55, %v788_v28  ;;  %v823_v21 = vadd.f32 %v1600_v57, %v789_v52  ;;  %v1850_v28 = vld [vmem:[#allocation36_spill] sm:$0xff]  ;;  %v1852_v52 = vld [vmem:[#allocation33_spill] sm:$0xff] }
 0x207   :  { %v824_v51 = vadd.f32 %v1603_v54, %v790_v48  ;;  %v825_v10 = vadd.f32 %v1608_v31, %v791_v6  ;;  %v871_v41 = vrot.slane %v866_v46, 5  ;;  %v872_v2 = vrot.slane %v866_v46, 6 }
 0x208   :  { %v882_v35 = vmul.f32 %v866_v46, %v1837_v36  ;;  %v883_v9 = vmul.f32 %v867_v47, %v1838_v40  ;;  %v856_v42 = vadd.f32 %v1625_v3, %v822_v20  ;;  %v857_v4 = vadd.f32 %v1628_v38, %v823_v21  ;;  %v1860_v40 = vld [vmem:[#allocation27_spill] sm:$0xff] }
 0x209   :  { %v858_v5 = vadd.f32 %v1631_v63, %v824_v51  ;;  %v859_v55 = vadd.f32 %v1635_v43, %v825_v10  ;;  %v884_v57 = vmul.f32 %v868_v49, %v1839_v22  ;;  %v885_v54 = vmul.f32 %v869_v16, %v1840_v61  ;;  %v1857_v51 = vld [vmem:[#allocation26_spill] sm:$0xff]  ;;  %v1858_v10 = vld [vmem:[#allocation29_spill] sm:$0xff] }
 0x20a   :  { %v886_v31 = vmul.f32 %v870_v17, %v1841_v62  ;;  %v887_v26 = vmul.f32 %v871_v41, %v1842_v1  ;;  %v890_v19 = vadd.f32 %v882_v35, %v856_v42  ;;  %v891_v23 = vadd.f32 %v883_v9, %v857_v4  ;;  %v1856_v17 = vld [vmem:[#allocation35_spill] sm:$0xff]  ;;  %v1862_v4 = vld [vmem:[#allocation38_spill] sm:$0xff] }
 0x20b   :  { %v761_v29 = vadd.f32 %v1687_v24, %v727_v37  ;;  %v1844_v3 = vrot.slane %v1681_v44, 6  ;;  %v892_v7 = vadd.f32 %v884_v57, %v858_v5  ;;  %v893_v63 = vadd.f32 %v885_v54, %v859_v55  ;;  %v1863_v57 = vld [vmem:[#allocation28_spill] sm:$0xff] }
 0x20c   :  { %v1846_v43 = vrot.slane %v1681_v44, 7  ;;  %v793_v13 = vadd.f32 %v1703_v27, %v759_v25  ;;  %v924_v14 = vadd.f32 %v1654_v58, %v890_v19  ;;  %v925_v53 = vadd.f32 %v1657_v50, %v891_v23  ;;  %v1849_v44 = vld [vmem:[#allocation32_spill] sm:$0xff]  ;;  %v1851_v25 = vld [vmem:[#allocation31_spill] sm:$0xff] }
 0x20d   :  { %v786_v38 = vmul.f32 %v1844_v3, %v1843_v0  ;;  %v826_v56 = vadd.f32 %v1611_v39, %v792_v32  ;;  %v873_v37 = vrot.slane %v866_v46, 7  ;;  %v888_v34 = vmul.f32 %v872_v2, %v1847_v30  ;;  %v1854_v39 = vld [vmem:[#allocation37_spill] sm:$0xff]  ;;  %v1855_v32 = vld [vmem:[#allocation34_spill] sm:$0xff] }
 0x20e   :  { %v787_v12 = vmul.f32 %v1846_v43, %v1845_v8  ;;  %v827_v15 = vadd.f32 %v1614_v11, %v793_v13  ;;  %v940_v59 = vrot.slane %v925_v53, 7  ;;  %v926_v27 = vadd.f32 %v1850_v28, %v892_v7 }
 0x20f   :  { %v794_v60 = vadd.f32 %v786_v38, %v760_v45  ;;  %v860_v47 = vadd.f32 %v1849_v44, %v826_v56  ;;  %v1853_v45 = vld [vmem:[#allocation25_spill] sm:$0xff]  ;;  %v927_v6 = vadd.f32 %v1854_v39, %v893_v63  ;;  %v1859_v41 = vrot.slane %v1858_v10, 5 }
 0x210   :  { %v795_v24 = vadd.f32 %v787_v12, %v761_v29  ;;  %v861_v50 = vadd.f32 %v1852_v52, %v827_v15  ;;  %v889_v48 = vmul.f32 %v873_v37, %v1853_v45  ;;  %v941_v49 = vsel %vm95_vm0, %v940_v59, %v924_v14 }
 0x211   :  { %v828_v18 = vadd.f32 %v1848_v33, %v794_v60  ;;  %v894_v46 = vadd.f32 %v886_v31, %v860_v47  ;;  %v942_v16 = vrot.slane %v926_v27, 6  ;;  %v921_v2 = vmul.f32 %v1859_v41, %v1857_v51 }
 0x212   :  { %v829_v58 = vadd.f32 %v1851_v25, %v795_v24  ;;  %v895_v21 = vadd.f32 %v887_v26, %v861_v50  ;;  %v944_v36 = vrot.slane %v927_v6, 5  ;;  %v1861_v9 = vrot.slane %v1858_v10, 6 }
 0x213   :  { %v862_v11 = vadd.f32 %v1855_v32, %v828_v18  ;;  %v928_v5 = vadd.f32 %v1862_v4, %v894_v46  ;;  %v943_v55 = vsel %vm98_vm1, %v942_v16, %v941_v49  ;;  %v1864_v61 = vrot.slane %v1858_v10, 7 }
 0x214   :  { %v863_v20 = vadd.f32 %v1856_v17, %v829_v58  ;;  %v922_v42 = vmul.f32 %v1861_v9, %v1860_v40  ;;  %v929_v62 = vadd.f32 %v921_v2, %v895_v21  ;;  %v945_v31 = vsel %vm101_vm2, %v944_v36, %v943_v55 }
 0x215   :  { %v896_v35 = vadd.f32 %v888_v34, %v862_v11  ;;  %v923_v54 = vmul.f32 %v1864_v61, %v1863_v57  ;;  %v946_v26 = vrot.slane %v928_v5, 4 }
 0x216   :  { %v897_v22 = vadd.f32 %v889_v48, %v863_v20  ;;  %v948_v23 = vrot.slane %v929_v62, 3 }
 0x217   :  { %v930_v1 = vadd.f32 %v922_v42, %v896_v35  ;;  %v947_v29 = vsel %vm104_vm3, %v946_v26, %v945_v31 }
 0x218   :  { %v931_v19 = vadd.f32 %v923_v54, %v897_v22  ;;  %v949_v3 = vsel %vm107_vm4, %v948_v23, %v947_v29 }
 0x219   :  { %v950_v0 = vrot.slane %v930_v1, 2 }
 0x21a   :  { %v952_v38 = vrot.slane %v931_v19, 1 }
 0x21b   :  { %v951_v7 = vsel %vm110_vm5, %v950_v0, %v949_v3 }
 0x21c   :  { %v953_v63 = vsel %vm113_vm6, %v952_v38, %v951_v7 }
 0x21d   :  { %955 = vst [vmem:[#allocation5] sm:$0xff] %v953_v63 }
 0x21e   :  { %966 = dma.vmem_to_hbm [thread:$0]  %s962_s4, 128, %s964_s6, [#allocation4]  }
 0x21f   :  { %1051 = dma.done.wait [#allocation4], 128  }
 0x220   :  { %1052 = vsyncadd [#allocation4], 4294967168 }
 0x221   :  { %971 = vsyncpa [#allocation3], 1 }
 0x222   :  { %972 = vsyncpa [#allocation4], 1 }

</bundles_post_ra>
